<compile_context>
chip_gen: v7x
topology: tpu7x:2x2x1
jax: 0.10.0
libtpu: 0.0.40
codegen_flags: <defaults>
</compile_context>

<pallas_src>
import functools

import jax
import jax.numpy as jnp
from jax import lax
from jax.experimental import pallas as pl
from jax.experimental.pallas import tpu as pltpu


def _round_up(x, m):
    return ((x + m - 1) // m) * m


def _convblock_kernel(x_ref, w_ref, s_ref, b_ref, o_ref, acc_ref,
                      *, KH, KW, Wq, stride, tl):
    # x_ref  : (1, S*S, Fq, Cin)  phase-split, padded, spatially-flattened image
    # w_ref  : (KH, KW, Cin, tn)  conv weights (unscaled), one Cout tile
    # s_ref  : (1, tn)            BN scale  = gamma / sqrt(var + eps)
    # b_ref  : (1, tn)            folded bias = (conv_bias - mean) * scale + beta
    # o_ref  : (1, tl, tn)        one M tile of output rows
    # acc_ref: (tl, tn) f32       VMEM accumulator scratch
    m = pl.program_id(2)                       # M-tile axis is always grid axis 2
    base = pl.multiple_of(m * tl, 8)

    first = True
    for kh in range(KH):
        for kw in range(KW):
            ph = (kh % stride) * stride + (kw % stride)          # static
            off = (kh // stride) * Wq + (kw // stride)           # static
            lhs = x_ref[0, ph, pl.ds(base + off, tl), :]         # (tl, Cin)
            part = jnp.dot(lhs, w_ref[kh, kw],
                           preferred_element_type=jnp.float32)   # (tl, tn)
            if first:
                acc_ref[...] = part
                first = False
            else:
                acc_ref[...] += part

    y = acc_ref[...] * s_ref[...] + b_ref[...]        # BN scale/shift in f32
    o_ref[0] = jnp.maximum(y, 0.0).astype(o_ref.dtype)


@functools.partial(jax.jit,
                   static_argnames=("stride", "padding", "eps", "tn", "tl",
                                    "compute_dtype"))
def conv_block_forward(x_nchw, weight, conv_bias, gamma, beta,
                       running_mean, running_var,
                       *, stride=1, padding=1, eps=1e-5, tn=128, tl=512,
                       compute_dtype=jnp.float32):
    N, Cin, H, W = x_nchw.shape
    Cout, Cin_w, KH, KW = weight.shape
    assert Cin == Cin_w
    assert tn % 128 == 0

    s = stride
    Ho = (H + 2 * padding - KH) // s + 1
    Wo = (W + 2 * padding - KW) // s + 1
    Hp = H + 2 * padding
    Wp = W + 2 * padding
    Hp2 = _round_up(Hp, s)
    Wp2 = _round_up(Wp, s)
    Hq, Wq = Hp2 // s, Wp2 // s

    # ---- activations: NHWC, pad, phase-split by stride, flatten spatial -------
    x = jnp.transpose(x_nchw, (0, 2, 3, 1)).astype(compute_dtype)       # NHWC
    x = jnp.pad(x, ((0, 0),
                    (padding, padding + Hp2 - Hp),
                    (padding, padding + Wp2 - Wp),
                    (0, 0)))
    x = x.reshape(N, Hq, s, Wq, s, Cin).transpose(0, 2, 4, 1, 3, 5)     # (N,s,s,Hq,Wq,Cin)
    x = x.reshape(N, s * s, Hq * Wq, Cin)

    Lq = Ho * Wq                                   # rows computed per image
    tl_eff = max(8, min(_round_up(tl, 8), _round_up(Lq, 8)))
    num_m = -(-Lq // tl_eff)                       # cdiv
    Lq_pad = num_m * tl_eff
    max_off = ((KH - 1) // s) * Wq + (KW - 1) // s
    Fq = _round_up(max(Hq * Wq, Lq_pad + max_off), 8)
    if Fq > Hq * Wq:
        x = jnp.pad(x, ((0, 0), (0, 0), (0, Fq - Hq * Wq), (0, 0)))

    # ---- weights / BN params (scale kept in f32 epilogue, not folded) ---------
    Cout_pad_min = _round_up(Cout, 128)
    tn_eff = min(tn, Cout_pad_min)
    Cout_pad = _round_up(Cout, tn_eff)

    w_t = jnp.transpose(weight, (2, 3, 1, 0)).astype(compute_dtype)     # (KH,KW,Cin,Cout)
    scale = (gamma / jnp.sqrt(running_var + eps)).astype(jnp.float32)
    bias = ((conv_bias - running_mean) * scale + beta).astype(jnp.float32)
    if Cout_pad != Cout:
        w_t = jnp.pad(w_t, ((0, 0), (0, 0), (0, 0), (0, Cout_pad - Cout)))
        scale = jnp.pad(scale, (0, Cout_pad - Cout))
        bias = jnp.pad(bias, (0, Cout_pad - Cout))
    scale2 = scale.reshape(1, Cout_pad)
    bias2 = bias.reshape(1, Cout_pad)

    num_j = Cout_pad // tn_eff
    out_dtype = compute_dtype

    # ---- adaptive grid order for weight-tile vs image residency ---------------
    itemsize = jnp.dtype(compute_dtype).itemsize
    w_bytes = KH * KW * Cin * Cout_pad * itemsize
    x_bytes = s * s * Fq * Cin * itemsize
    weights_outer = w_bytes > x_bytes

    if weights_outer:
        grid = (num_j, N, num_m)
        x_map = lambda j, n, m: (n, 0, 0, 0)
        w_map = lambda j, n, m: (0, 0, 0, j)
        v_map = lambda j, n, m: (0, j)
        o_map = lambda j, n, m: (n, m, j)
    else:
        grid = (N, num_j, num_m)
        x_map = lambda n, j, m: (n, 0, 0, 0)
        w_map = lambda n, j, m: (0, 0, 0, j)
        v_map = lambda n, j, m: (0, j)
        o_map = lambda n, j, m: (n, m, j)

    flops = 2 * N * Ho * Wo * Cout * KH * KW * Cin
    bytes_accessed = (x.size * itemsize + w_t.size * itemsize
                      + N * Lq_pad * Cout_pad * jnp.dtype(out_dtype).itemsize)
    cost = pl.CostEstimate(flops=flops, transcendentals=0,
                           bytes_accessed=bytes_accessed)

    kernel = functools.partial(_convblock_kernel,
                               KH=KH, KW=KW, Wq=Wq, stride=s, tl=tl_eff)

    out = pl.pallas_call(
        kernel,
        out_shape=jax.ShapeDtypeStruct((N, Lq_pad, Cout_pad), out_dtype),
        grid_spec=pltpu.PrefetchScalarGridSpec(
            num_scalar_prefetch=0,
            grid=grid,
            in_specs=[
                pl.BlockSpec((1, s * s, Fq, Cin), x_map),
                pl.BlockSpec((KH, KW, Cin, tn_eff), w_map),
                pl.BlockSpec((1, tn_eff), v_map),
                pl.BlockSpec((1, tn_eff), v_map),
            ],
            out_specs=pl.BlockSpec((1, tl_eff, tn_eff), o_map),
            scratch_shapes=[pltpu.VMEM((tl_eff, tn_eff), jnp.float32)],
        ),
        compiler_params=pltpu.CompilerParams(
            dimension_semantics=("parallel", "parallel", "parallel"),
            vmem_limit_bytes=48 * 1024 * 1024),
        cost_estimate=cost,
    )(x, w_t, scale2, bias2)

    # drop junk rows/cols and channel padding; back to NCHW for API parity.
    out = out[:, :Lq].reshape(N, Ho, Wq, Cout_pad)[:, :, :Wo, :Cout]
    return jnp.transpose(out, (0, 3, 1, 2))


def _reference(x_nchw, weight, conv_bias, gamma, beta, running_mean, running_var,
               *, stride=1, padding=1, eps=1e-5):
    y = lax.conv_general_dilated(
        x_nchw.astype(jnp.float32), weight.astype(jnp.float32),
        window_strides=(stride, stride),
        padding=[(padding, padding), (padding, padding)],
        dimension_numbers=("NCHW", "OIHW", "NCHW"))
    y = y + conv_bias.reshape(1, -1, 1, 1)
    y = (y - running_mean.reshape(1, -1, 1, 1)) / jnp.sqrt(
        running_var.reshape(1, -1, 1, 1) + eps)
    y = y * gamma.reshape(1, -1, 1, 1) + beta.reshape(1, -1, 1, 1)
    return jnp.maximum(y, 0.0)


if __name__ == "__main__":
    # ConvBlock(in_channels=4, out_channels=8, kernel_size=3, padding=1)
    N, Cin, H, W = 2, 4, 16, 16
    Cout, KH, KW = 8, 3, 3

    key = jax.random.PRNGKey(0)
    kx, kw, kb = jax.random.split(key, 3)

    x = jax.random.normal(kx, (N, Cin, H, W), dtype=jnp.float32)
    weight = jax.random.normal(kw, (Cout, Cin, KH, KW), dtype=jnp.float32) * 0.1
    conv_bias = jax.random.normal(kb, (Cout,), dtype=jnp.float32) * 0.1

    # Deterministic BatchNorm parameters / running stats (inference mode).
    gamma = 1.0 + 0.05 * jnp.arange(Cout, dtype=jnp.float32)
    beta = 0.02 * jnp.arange(Cout, dtype=jnp.float32)
    running_mean = 0.01 * jnp.arange(Cout, dtype=jnp.float32)
    running_var = 1.0 + 0.03 * jnp.arange(Cout, dtype=jnp.float32)

    y_ref = _reference(x, weight, conv_bias, gamma, beta, running_mean, running_var,
                       stride=1, padding=1)

    # f32 compute path: tight tolerance.
    y_f32 = conv_block_forward(x, weight, conv_bias, gamma, beta,
                               running_mean, running_var,
                               stride=1, padding=1,
                               compute_dtype=jnp.float32)
    y_f32 = jax.block_until_ready(y_f32)
    if not jnp.allclose(y_f32, y_ref, atol=1e-4, rtol=1e-4):
        raise AssertionError("Pallas ConvBlock (f32) output mismatch vs reference")

    # bf16 compute/store path (perf default on v6e/v7x): loosened tolerance.
    y_bf16 = conv_block_forward(x, weight, conv_bias, gamma, beta,
                                running_mean, running_var,
                                stride=1, padding=1,
                                compute_dtype=jnp.bfloat16)
    y_bf16 = jax.block_until_ready(y_bf16)
    if not jnp.allclose(y_bf16.astype(jnp.float32), y_ref, atol=5e-2, rtol=5e-2):
        raise AssertionError("Pallas ConvBlock (bf16) output mismatch vs reference")

    print("KERNEL_OK")
</pallas_src>

<mosaic_0001>
module attributes {stable_mosaic.version = 11 : i64} {
  func.func @_convblock_kernel(%arg0: i32, %arg1: i32, %arg2: i32, %arg3: memref<1x1x328x4xf32, #tpu.memory_space<vmem>>, %arg4: memref<3x3x4x128xf32, #tpu.memory_space<vmem>>, %arg5: memref<1x128xf32, #tpu.memory_space<vmem>>, %arg6: memref<1x128xf32, #tpu.memory_space<vmem>>, %arg7: memref<1x288x128xf32, #tpu.memory_space<vmem>>, %arg8: memref<288x128xf32, #tpu.memory_space<vmem>>) attributes {dimension_semantics = [#tpu.dimension_semantics<parallel>, #tpu.dimension_semantics<parallel>, #tpu.dimension_semantics<parallel>], iteration_bounds = array<i64: 1, 2, 1>, scalar_prefetch = 0 : i64, scratch_operands = 1 : i64, tpu.core_type = #tpu.core_type<tc>, window_params = [{transform_indices = @transform_0, window_bounds = array<i64: 1, 1, 328, 4>}, {transform_indices = @transform_1, window_bounds = array<i64: 3, 3, 4, 128>}, {transform_indices = @transform_2, window_bounds = array<i64: 1, 128>}, {transform_indices = @transform_3, window_bounds = array<i64: 1, 128>}, {transform_indices = @transform_4, window_bounds = array<i64: 1, 288, 128>}]} {
    %c288_i32 = arith.constant 288 : i32
    %0 = arith.muli %arg2, %c288_i32 : i32
    %1 = tpu.assume_multiple %0, 8 : i32
    %c0_i32 = arith.constant 0 : i32
    %2 = arith.addi %1, %c0_i32 : i32
    %c0 = arith.constant 0 : index
    %c0_0 = arith.constant 0 : index
    %3 = arith.index_cast %2 : i32 to index
    %c0_1 = arith.constant 0 : index
    %4 = vector.load %arg3[%c0, %c0_0, %3, %c0_1] : memref<1x1x328x4xf32, #tpu.memory_space<vmem>>, vector<1x1x288x4xf32>
    %5 = vector.shape_cast %4 : vector<1x1x288x4xf32> to vector<288x4xf32>
    %c0_2 = arith.constant 0 : index
    %c0_3 = arith.constant 0 : index
    %c0_4 = arith.constant 0 : index
    %c0_5 = arith.constant 0 : index
    %6 = vector.load %arg4[%c0_2, %c0_3, %c0_4, %c0_5] : memref<3x3x4x128xf32, #tpu.memory_space<vmem>>, vector<1x1x4x128xf32>
    %7 = vector.shape_cast %6 : vector<1x1x4x128xf32> to vector<4x128xf32>
    %cst = arith.constant dense<0.000000e+00> : vector<288x128xf32>
    %8 = tpu.matmul %5, %7, %cst {dimension_numbers = #tpu.dot_dimension_numbers<[1], [0], [0], [1], [0, 0, 1, 1], [], []>} : vector<288x4xf32>, vector<4x128xf32>, vector<288x128xf32> -> vector<288x128xf32>
    %c0_6 = arith.constant 0 : index
    %c0_7 = arith.constant 0 : index
    %9 = vector.load %arg8[%c0_6, %c0_7] : memref<288x128xf32, #tpu.memory_space<vmem>>, vector<288x128xf32>
    tpu.vector_store %arg8[%c0_6, %c0_7], %8 {strides = array<i32>} : memref<288x128xf32, #tpu.memory_space<vmem>>, vector<288x128xf32>,
    %c1_i32 = arith.constant 1 : i32
    %10 = arith.addi %1, %c1_i32 : i32
    %c0_8 = arith.constant 0 : index
    %c0_9 = arith.constant 0 : index
    %11 = arith.index_cast %10 : i32 to index
    %c0_10 = arith.constant 0 : index
    %12 = vector.load %arg3[%c0_8, %c0_9, %11, %c0_10] : memref<1x1x328x4xf32, #tpu.memory_space<vmem>>, vector<1x1x288x4xf32>
    %13 = vector.shape_cast %12 : vector<1x1x288x4xf32> to vector<288x4xf32>
    %c0_11 = arith.constant 0 : index
    %c1 = arith.constant 1 : index
    %c0_12 = arith.constant 0 : index
    %c0_13 = arith.constant 0 : index
    %14 = vector.load %arg4[%c0_11, %c1, %c0_12, %c0_13] : memref<3x3x4x128xf32, #tpu.memory_space<vmem>>, vector<1x1x4x128xf32>
    %15 = vector.shape_cast %14 : vector<1x1x4x128xf32> to vector<4x128xf32>
    %cst_14 = arith.constant dense<0.000000e+00> : vector<288x128xf32>
    %16 = tpu.matmul %13, %15, %cst_14 {dimension_numbers = #tpu.dot_dimension_numbers<[1], [0], [0], [1], [0, 0, 1, 1], [], []>} : vector<288x4xf32>, vector<4x128xf32>, vector<288x128xf32> -> vector<288x128xf32>
    %c0_15 = arith.constant 0 : index
    %c0_16 = arith.constant 0 : index
    %17 = vector.load %arg8[%c0_15, %c0_16] : memref<288x128xf32, #tpu.memory_space<vmem>>, vector<288x128xf32>
    %18 = arith.addf %17, %16 : vector<288x128xf32>
    %c0_17 = arith.constant 0 : index
    %c0_18 = arith.constant 0 : index
    %19 = vector.load %arg8[%c0_17, %c0_18] : memref<288x128xf32, #tpu.memory_space<vmem>>, vector<288x128xf32>
    tpu.vector_store %arg8[%c0_17, %c0_18], %18 {strides = array<i32>} : memref<288x128xf32, #tpu.memory_space<vmem>>, vector<288x128xf32>,
    %c2_i32 = arith.constant 2 : i32
    %20 = arith.addi %1, %c2_i32 : i32
    %c0_19 = arith.constant 0 : index
    %c0_20 = arith.constant 0 : index
    %21 = arith.index_cast %20 : i32 to index
    %c0_21 = arith.constant 0 : index
    %22 = vector.load %arg3[%c0_19, %c0_20, %21, %c0_21] : memref<1x1x328x4xf32, #tpu.memory_space<vmem>>, vector<1x1x288x4xf32>
    %23 = vector.shape_cast %22 : vector<1x1x288x4xf32> to vector<288x4xf32>
    %c0_22 = arith.constant 0 : index
    %c2 = arith.constant 2 : index
    %c0_23 = arith.constant 0 : index
    %c0_24 = arith.constant 0 : index
    %24 = vector.load %arg4[%c0_22, %c2, %c0_23, %c0_24] : memref<3x3x4x128xf32, #tpu.memory_space<vmem>>, vector<1x1x4x128xf32>
    %25 = vector.shape_cast %24 : vector<1x1x4x128xf32> to vector<4x128xf32>
    %cst_25 = arith.constant dense<0.000000e+00> : vector<288x128xf32>
    %26 = tpu.matmul %23, %25, %cst_25 {dimension_numbers = #tpu.dot_dimension_numbers<[1], [0], [0], [1], [0, 0, 1, 1], [], []>} : vector<288x4xf32>, vector<4x128xf32>, vector<288x128xf32> -> vector<288x128xf32>
    %c0_26 = arith.constant 0 : index
    %c0_27 = arith.constant 0 : index
    %27 = vector.load %arg8[%c0_26, %c0_27] : memref<288x128xf32, #tpu.memory_space<vmem>>, vector<288x128xf32>
    %28 = arith.addf %27, %26 : vector<288x128xf32>
    %c0_28 = arith.constant 0 : index
    %c0_29 = arith.constant 0 : index
    %29 = vector.load %arg8[%c0_28, %c0_29] : memref<288x128xf32, #tpu.memory_space<vmem>>, vector<288x128xf32>
    tpu.vector_store %arg8[%c0_28, %c0_29], %28 {strides = array<i32>} : memref<288x128xf32, #tpu.memory_space<vmem>>, vector<288x128xf32>,
    %c18_i32 = arith.constant 18 : i32
    %30 = arith.addi %1, %c18_i32 : i32
    %c0_30 = arith.constant 0 : index
    %c0_31 = arith.constant 0 : index
    %31 = arith.index_cast %30 : i32 to index
    %c0_32 = arith.constant 0 : index
    %32 = vector.load %arg3[%c0_30, %c0_31, %31, %c0_32] : memref<1x1x328x4xf32, #tpu.memory_space<vmem>>, vector<1x1x288x4xf32>
    %33 = vector.shape_cast %32 : vector<1x1x288x4xf32> to vector<288x4xf32>
    %c1_33 = arith.constant 1 : index
    %c0_34 = arith.constant 0 : index
    %c0_35 = arith.constant 0 : index
    %c0_36 = arith.constant 0 : index
    %34 = vector.load %arg4[%c1_33, %c0_34, %c0_35, %c0_36] : memref<3x3x4x128xf32, #tpu.memory_space<vmem>>, vector<1x1x4x128xf32>
    %35 = vector.shape_cast %34 : vector<1x1x4x128xf32> to vector<4x128xf32>
    %cst_37 = arith.constant dense<0.000000e+00> : vector<288x128xf32>
    %36 = tpu.matmul %33, %35, %cst_37 {dimension_numbers = #tpu.dot_dimension_numbers<[1], [0], [0], [1], [0, 0, 1, 1], [], []>} : vector<288x4xf32>, vector<4x128xf32>, vector<288x128xf32> -> vector<288x128xf32>
    %c0_38 = arith.constant 0 : index
    %c0_39 = arith.constant 0 : index
    %37 = vector.load %arg8[%c0_38, %c0_39] : memref<288x128xf32, #tpu.memory_space<vmem>>, vector<288x128xf32>
    %38 = arith.addf %37, %36 : vector<288x128xf32>
    %c0_40 = arith.constant 0 : index
    %c0_41 = arith.constant 0 : index
    %39 = vector.load %arg8[%c0_40, %c0_41] : memref<288x128xf32, #tpu.memory_space<vmem>>, vector<288x128xf32>
    tpu.vector_store %arg8[%c0_40, %c0_41], %38 {strides = array<i32>} : memref<288x128xf32, #tpu.memory_space<vmem>>, vector<288x128xf32>,
    %c19_i32 = arith.constant 19 : i32
    %40 = arith.addi %1, %c19_i32 : i32
    %c0_42 = arith.constant 0 : index
    %c0_43 = arith.constant 0 : index
    %41 = arith.index_cast %40 : i32 to index
    %c0_44 = arith.constant 0 : index
    %42 = vector.load %arg3[%c0_42, %c0_43, %41, %c0_44] : memref<1x1x328x4xf32, #tpu.memory_space<vmem>>, vector<1x1x288x4xf32>
    %43 = vector.shape_cast %42 : vector<1x1x288x4xf32> to vector<288x4xf32>
    %c1_45 = arith.constant 1 : index
    %c1_46 = arith.constant 1 : index
    %c0_47 = arith.constant 0 : index
    %c0_48 = arith.constant 0 : index
    %44 = vector.load %arg4[%c1_45, %c1_46, %c0_47, %c0_48] : memref<3x3x4x128xf32, #tpu.memory_space<vmem>>, vector<1x1x4x128xf32>
    %45 = vector.shape_cast %44 : vector<1x1x4x128xf32> to vector<4x128xf32>
    %cst_49 = arith.constant dense<0.000000e+00> : vector<288x128xf32>
    %46 = tpu.matmul %43, %45, %cst_49 {dimension_numbers = #tpu.dot_dimension_numbers<[1], [0], [0], [1], [0, 0, 1, 1], [], []>} : vector<288x4xf32>, vector<4x128xf32>, vector<288x128xf32> -> vector<288x128xf32>
    %c0_50 = arith.constant 0 : index
    %c0_51 = arith.constant 0 : index
    %47 = vector.load %arg8[%c0_50, %c0_51] : memref<288x128xf32, #tpu.memory_space<vmem>>, vector<288x128xf32>
    %48 = arith.addf %47, %46 : vector<288x128xf32>
    %c0_52 = arith.constant 0 : index
    %c0_53 = arith.constant 0 : index
    %49 = vector.load %arg8[%c0_52, %c0_53] : memref<288x128xf32, #tpu.memory_space<vmem>>, vector<288x128xf32>
    tpu.vector_store %arg8[%c0_52, %c0_53], %48 {strides = array<i32>} : memref<288x128xf32, #tpu.memory_space<vmem>>, vector<288x128xf32>,
    %c20_i32 = arith.constant 20 : i32
    %50 = arith.addi %1, %c20_i32 : i32
    %c0_54 = arith.constant 0 : index
    %c0_55 = arith.constant 0 : index
    %51 = arith.index_cast %50 : i32 to index
    %c0_56 = arith.constant 0 : index
    %52 = vector.load %arg3[%c0_54, %c0_55, %51, %c0_56] : memref<1x1x328x4xf32, #tpu.memory_space<vmem>>, vector<1x1x288x4xf32>
    %53 = vector.shape_cast %52 : vector<1x1x288x4xf32> to vector<288x4xf32>
    %c1_57 = arith.constant 1 : index
    %c2_58 = arith.constant 2 : index
    %c0_59 = arith.constant 0 : index
    %c0_60 = arith.constant 0 : index
    %54 = vector.load %arg4[%c1_57, %c2_58, %c0_59, %c0_60] : memref<3x3x4x128xf32, #tpu.memory_space<vmem>>, vector<1x1x4x128xf32>
    %55 = vector.shape_cast %54 : vector<1x1x4x128xf32> to vector<4x128xf32>
    %cst_61 = arith.constant dense<0.000000e+00> : vector<288x128xf32>
    %56 = tpu.matmul %53, %55, %cst_61 {dimension_numbers = #tpu.dot_dimension_numbers<[1], [0], [0], [1], [0, 0, 1, 1], [], []>} : vector<288x4xf32>, vector<4x128xf32>, vector<288x128xf32> -> vector<288x128xf32>
    %c0_62 = arith.constant 0 : index
    %c0_63 = arith.constant 0 : index
    %57 = vector.load %arg8[%c0_62, %c0_63] : memref<288x128xf32, #tpu.memory_space<vmem>>, vector<288x128xf32>
    %58 = arith.addf %57, %56 : vector<288x128xf32>
    %c0_64 = arith.constant 0 : index
    %c0_65 = arith.constant 0 : index
    %59 = vector.load %arg8[%c0_64, %c0_65] : memref<288x128xf32, #tpu.memory_space<vmem>>, vector<288x128xf32>
    tpu.vector_store %arg8[%c0_64, %c0_65], %58 {strides = array<i32>} : memref<288x128xf32, #tpu.memory_space<vmem>>, vector<288x128xf32>,
    %c36_i32 = arith.constant 36 : i32
    %60 = arith.addi %1, %c36_i32 : i32
    %c0_66 = arith.constant 0 : index
    %c0_67 = arith.constant 0 : index
    %61 = arith.index_cast %60 : i32 to index
    %c0_68 = arith.constant 0 : index
    %62 = vector.load %arg3[%c0_66, %c0_67, %61, %c0_68] : memref<1x1x328x4xf32, #tpu.memory_space<vmem>>, vector<1x1x288x4xf32>
    %63 = vector.shape_cast %62 : vector<1x1x288x4xf32> to vector<288x4xf32>
    %c2_69 = arith.constant 2 : index
    %c0_70 = arith.constant 0 : index
    %c0_71 = arith.constant 0 : index
    %c0_72 = arith.constant 0 : index
    %64 = vector.load %arg4[%c2_69, %c0_70, %c0_71, %c0_72] : memref<3x3x4x128xf32, #tpu.memory_space<vmem>>, vector<1x1x4x128xf32>
    %65 = vector.shape_cast %64 : vector<1x1x4x128xf32> to vector<4x128xf32>
    %cst_73 = arith.constant dense<0.000000e+00> : vector<288x128xf32>
    %66 = tpu.matmul %63, %65, %cst_73 {dimension_numbers = #tpu.dot_dimension_numbers<[1], [0], [0], [1], [0, 0, 1, 1], [], []>} : vector<288x4xf32>, vector<4x128xf32>, vector<288x128xf32> -> vector<288x128xf32>
    %c0_74 = arith.constant 0 : index
    %c0_75 = arith.constant 0 : index
    %67 = vector.load %arg8[%c0_74, %c0_75] : memref<288x128xf32, #tpu.memory_space<vmem>>, vector<288x128xf32>
    %68 = arith.addf %67, %66 : vector<288x128xf32>
    %c0_76 = arith.constant 0 : index
    %c0_77 = arith.constant 0 : index
    %69 = vector.load %arg8[%c0_76, %c0_77] : memref<288x128xf32, #tpu.memory_space<vmem>>, vector<288x128xf32>
    tpu.vector_store %arg8[%c0_76, %c0_77], %68 {strides = array<i32>} : memref<288x128xf32, #tpu.memory_space<vmem>>, vector<288x128xf32>,
    %c37_i32 = arith.constant 37 : i32
    %70 = arith.addi %1, %c37_i32 : i32
    %c0_78 = arith.constant 0 : index
    %c0_79 = arith.constant 0 : index
    %71 = arith.index_cast %70 : i32 to index
    %c0_80 = arith.constant 0 : index
    %72 = vector.load %arg3[%c0_78, %c0_79, %71, %c0_80] : memref<1x1x328x4xf32, #tpu.memory_space<vmem>>, vector<1x1x288x4xf32>
    %73 = vector.shape_cast %72 : vector<1x1x288x4xf32> to vector<288x4xf32>
    %c2_81 = arith.constant 2 : index
    %c1_82 = arith.constant 1 : index
    %c0_83 = arith.constant 0 : index
    %c0_84 = arith.constant 0 : index
    %74 = vector.load %arg4[%c2_81, %c1_82, %c0_83, %c0_84] : memref<3x3x4x128xf32, #tpu.memory_space<vmem>>, vector<1x1x4x128xf32>
    %75 = vector.shape_cast %74 : vector<1x1x4x128xf32> to vector<4x128xf32>
    %cst_85 = arith.constant dense<0.000000e+00> : vector<288x128xf32>
    %76 = tpu.matmul %73, %75, %cst_85 {dimension_numbers = #tpu.dot_dimension_numbers<[1], [0], [0], [1], [0, 0, 1, 1], [], []>} : vector<288x4xf32>, vector<4x128xf32>, vector<288x128xf32> -> vector<288x128xf32>
    %c0_86 = arith.constant 0 : index
    %c0_87 = arith.constant 0 : index
    %77 = vector.load %arg8[%c0_86, %c0_87] : memref<288x128xf32, #tpu.memory_space<vmem>>, vector<288x128xf32>
    %78 = arith.addf %77, %76 : vector<288x128xf32>
    %c0_88 = arith.constant 0 : index
    %c0_89 = arith.constant 0 : index
    %79 = vector.load %arg8[%c0_88, %c0_89] : memref<288x128xf32, #tpu.memory_space<vmem>>, vector<288x128xf32>
    tpu.vector_store %arg8[%c0_88, %c0_89], %78 {strides = array<i32>} : memref<288x128xf32, #tpu.memory_space<vmem>>, vector<288x128xf32>,
    %c38_i32 = arith.constant 38 : i32
    %80 = arith.addi %1, %c38_i32 : i32
    %c0_90 = arith.constant 0 : index
    %c0_91 = arith.constant 0 : index
    %81 = arith.index_cast %80 : i32 to index
    %c0_92 = arith.constant 0 : index
    %82 = vector.load %arg3[%c0_90, %c0_91, %81, %c0_92] : memref<1x1x328x4xf32, #tpu.memory_space<vmem>>, vector<1x1x288x4xf32>
    %83 = vector.shape_cast %82 : vector<1x1x288x4xf32> to vector<288x4xf32>
    %c2_93 = arith.constant 2 : index
    %c2_94 = arith.constant 2 : index
    %c0_95 = arith.constant 0 : index
    %c0_96 = arith.constant 0 : index
    %84 = vector.load %arg4[%c2_93, %c2_94, %c0_95, %c0_96] : memref<3x3x4x128xf32, #tpu.memory_space<vmem>>, vector<1x1x4x128xf32>
    %85 = vector.shape_cast %84 : vector<1x1x4x128xf32> to vector<4x128xf32>
    %cst_97 = arith.constant dense<0.000000e+00> : vector<288x128xf32>
    %86 = tpu.matmul %83, %85, %cst_97 {dimension_numbers = #tpu.dot_dimension_numbers<[1], [0], [0], [1], [0, 0, 1, 1], [], []>} : vector<288x4xf32>, vector<4x128xf32>, vector<288x128xf32> -> vector<288x128xf32>
    %c0_98 = arith.constant 0 : index
    %c0_99 = arith.constant 0 : index
    %87 = vector.load %arg8[%c0_98, %c0_99] : memref<288x128xf32, #tpu.memory_space<vmem>>, vector<288x128xf32>
    %88 = arith.addf %87, %86 : vector<288x128xf32>
    %c0_100 = arith.constant 0 : index
    %c0_101 = arith.constant 0 : index
    %89 = vector.load %arg8[%c0_100, %c0_101] : memref<288x128xf32, #tpu.memory_space<vmem>>, vector<288x128xf32>
    tpu.vector_store %arg8[%c0_100, %c0_101], %88 {strides = array<i32>} : memref<288x128xf32, #tpu.memory_space<vmem>>, vector<288x128xf32>,
    %c0_102 = arith.constant 0 : index
    %c0_103 = arith.constant 0 : index
    %90 = vector.load %arg8[%c0_102, %c0_103] : memref<288x128xf32, #tpu.memory_space<vmem>>, vector<288x128xf32>
    %c0_104 = arith.constant 0 : index
    %c0_105 = arith.constant 0 : index
    %91 = vector.load %arg5[%c0_104, %c0_105] : memref<1x128xf32, #tpu.memory_space<vmem>>, vector<1x128xf32>
    %92 = vector.broadcast %91 : vector<1x128xf32> to vector<288x128xf32>
    %93 = arith.mulf %90, %92 : vector<288x128xf32>
    %c0_106 = arith.constant 0 : index
    %c0_107 = arith.constant 0 : index
    %94 = vector.load %arg6[%c0_106, %c0_107] : memref<1x128xf32, #tpu.memory_space<vmem>>, vector<1x128xf32>
    %95 = vector.broadcast %94 : vector<1x128xf32> to vector<288x128xf32>
    %96 = arith.addf %93, %95 : vector<288x128xf32>
    %cst_108 = arith.constant 0.000000e+00 : f32
    %97 = vector.broadcast %cst_108 : f32 to vector<288x128xf32>
    %98 = arith.maximumf %96, %97 : vector<288x128xf32>
    %c0_109 = arith.constant 0 : index
    %c0_110 = arith.constant 0 : index
    %c0_111 = arith.constant 0 : index
    %99 = vector.load %arg7[%c0_109, %c0_110, %c0_111] : memref<1x288x128xf32, #tpu.memory_space<vmem>>, vector<1x288x128xf32>
    %100 = vector.shape_cast %99 : vector<1x288x128xf32> to vector<288x128xf32>
    %101 = vector.shape_cast %98 : vector<288x128xf32> to vector<1x288x128xf32>
    tpu.vector_store %arg7[%c0_109, %c0_110, %c0_111], %101 {strides = array<i32>} : memref<1x288x128xf32, #tpu.memory_space<vmem>>, vector<1x288x128xf32>,
    return
  }
  func.func @transform_0(%arg0: i32, %arg1: i32, %arg2: i32) -> (i32, i32, i32, i32) {
    %c0_i32 = arith.constant 0 : i32
    %c0_i32_0 = arith.constant 0 : i32
    %c0_i32_1 = arith.constant 0 : i32
    %c0_i32_2 = arith.constant 0 : i32
    return %arg1, %c0_i32, %c0_i32_0, %c0_i32_1 : i32, i32, i32, i32
  }
  func.func @transform_1(%arg0: i32, %arg1: i32, %arg2: i32) -> (i32, i32, i32, i32) {
    %c0_i32 = arith.constant 0 : i32
    %c0_i32_0 = arith.constant 0 : i32
    %c0_i32_1 = arith.constant 0 : i32
    %c0_i32_2 = arith.constant 0 : i32
    return %c0_i32, %c0_i32_0, %c0_i32_1, %arg0 : i32, i32, i32, i32
  }
  func.func @transform_2(%arg0: i32, %arg1: i32, %arg2: i32) -> (i32, i32) {
    %c0_i32 = arith.constant 0 : i32
    %c0_i32_0 = arith.constant 0 : i32
    return %c0_i32, %arg0 : i32, i32
  }
  func.func @transform_3(%arg0: i32, %arg1: i32, %arg2: i32) -> (i32, i32) {
    %c0_i32 = arith.constant 0 : i32
    %c0_i32_0 = arith.constant 0 : i32
    return %c0_i32, %arg0 : i32, i32
  }
  func.func @transform_4(%arg0: i32, %arg1: i32, %arg2: i32) -> (i32, i32, i32) {
    %c0_i32 = arith.constant 0 : i32
    return %arg1, %arg2, %arg0 : i32, i32, i32
  }
}

</mosaic_0001>

<bundles_post_ra>
// kernel: conv_block_forward.1
= control target key start
LH: loop header
LB: loop body
LE: loop exit
PB: predicated region body
PF: predicated region fallthrough
CT: control target
= control target key end

     0   :  { %s6944_s15 = smov 0   ;;  %s6946_s16 = smov 0   ;;  %s8052_s0 = inlined_call_operand.vmem [shape: f32[2,1,328,4], index: 0, kind: input, shape index: {}]   ;;  %s8053_s1 = inlined_call_operand.vmem [shape: f32[3,3,4,128], index: 1, kind: input, shape index: {}]   ;;  %s8054_s2 = inlined_call_operand.vmem [shape: f32[1,128], index: 2, kind: input, shape index: {}]   ;;  %s8055_s3 = inlined_call_operand.vmem [shape: f32[1,128], index: 3, kind: input, shape index: {}]   ;;  %s8056_s4 = inlined_call_operand.vmem [shape: f32[2,288,128], index: 4, kind: output, shape index: {}]  }
   0x1   :  { %s6948_s17 = smov 0  }
   0x2 LB: > { %s29_s18 = sadd.s32 1, %s6913_s16  ;;  %p5106_p0 = scmp.ge.s32.totalorder %s6917_s17, 1  ;;  %s6917_s17 = sphi %s6948_s17, %s14_s17   ;;  %s6913_s16 = sphi %s6946_s16, %s8058_s16   ;;  %s6909_s15 = sphi %s6944_s15, %s8057_s15  }
   0x3   : > { %p31_p1 = scmp.ge.s32.totalorder %s29_s18, 2  ;;  %p210_p2 = scmp.lt.s32.totalorder %s6917_s17, 3 }
   0x5   : > { %s8060_s18 = smov (%p31_p1, %s29_s18), 0  ;;  %p211_p3 = pnand %p5106_p0, %p210_p2 }
   0x6   : > { %v319_v0 = vld [vmem:[%s8053_s1] sm:$0xf] (!%p211_p3)  ;;  %vm429_vm0 = vcmask (!%p211_p3), 1043456   ;;  %v6968_v1 = vld [vmem:[%s8053_s1 + $0x10] sm:$0xf] (!%p211_p3)  ;;  %p253_p4 = scmp.lt.s32.totalorder (!%p211_p3), %s6909_s15, 1 }
   0x7   : > { %214 = sbr.rel (%p211_p3) target bundleno = 562 (0x232), region = 36  ;;  %6075 = vmatprep.subr.msk.mxu1 (!%p211_p3), %vm429_vm0, %v319_v0  ;;  %6299 = vmatprep.subr.msk.mxu0 (!%p211_p3), %vm429_vm0, %v6968_v1  ;;  %v5182_v2 = vld [vmem:[%s8053_s1 + $0x4] sm:$0xf] (!%p211_p3)  ;;  %v5478_v3 = vld [vmem:[%s8053_s1 + $0x14] sm:$0xf] (!%p211_p3)  ;;  %vm320_vm1 = vcmask (!%p211_p3), 31744  }
   0x8   : > { %6076 = vmatpush3.msk.msra.mxu1 (!%p211_p3), %vm429_vm0, %v319_v0  ;;  %6300 = vmatpush3.msk.msra.mxu0 (!%p211_p3), %vm429_vm0, %v6968_v1  ;;  %v7005_v10 = vld [vmem:[%s8053_s1 + $0x18] sm:$0xf] (!%p211_p3)  ;;  %v7010_v11 = vld [vmem:[%s8053_s1 + $0x8] sm:$0xf] (!%p211_p3)  ;;  %v7093_v48 = vld [vmem:[%s8053_s1 + $0x1c] sm:$0xf] (!%p211_p3) }
   0x9   : > { %6131 = vmatprep.subr.msk.mxu1 (!%p211_p3), %vm429_vm0, %v5182_v2  ;;  %6355 = vmatprep.subr.msk.mxu0 (!%p211_p3), %vm429_vm0, %v5478_v3 }
   0xe   : > { %s8062_s15 = smov (!%p253_p4, %s6909_s15), 1 }
   0xf   : > { %s6869_s27 = smul.u32 328, %s8062_s15 }
  0x10   : > { %s6870_s21 = smul.u32 288, %s8062_s15 }
  0x11   : > { %s6990_s30 = scalar_lea.vmem %s8052_s0, %s6869_s27 }
  0x12   : > { %v283_v4 = vld [vmem:[%s6990_s30] sm:$0xff]  ;;  %v5368_v5 = vld [vmem:[%s6990_s30 + $0x13] sm:$0xff]  ;;  %v284_v6 = vld [vmem:[%s6990_s30 + $0x8] sm:$0xff]  ;;  %s7928_s26 = scalar_lea.vmem %s8056_s4, %s6870_s21 }
  0x13   : > { %6077 = vmatprep.mubr.msk.f32.mxu1 %vm320_vm1, %v283_v4  ;;  %6301 = vmatprep.mubr.msk.f32.mxu0 %vm320_vm1, %v5368_v5  ;;  %v5369_v7 = vld [vmem:[%s6990_s30 + $0x1b] sm:$0xff]  ;;  %v285_v8 = vld [vmem:[%s6990_s30 + $0x10] sm:$0xff]  ;;  %v5370_v9 = vld [vmem:[%s6990_s30 + $0x23] sm:$0xff] }
  0x14   : > { %6078 = vmatmul.mubr.msk.f32.vlgmr.msra.gmra.mrb[0].mxu1 %vm320_vm1, %v284_v6  ;;  %6302 = vmatmul.mubr.msk.f32.vlgmr.msra.gmra.mrb[0].mxu0 %vm320_vm1, %v5369_v7  ;;  %v286_v12 = vld [vmem:[%s6990_s30 + $0x18] sm:$0xff]  ;;  %v5371_v13 = vld [vmem:[%s6990_s30 + $0x2b] sm:$0xff]  ;;  %v287_v14 = vld [vmem:[%s6990_s30 + $0x20] sm:$0xff] }
  0x15   : > { %6132 = vmatpush3.msk.msra.mxu1 %vm429_vm0, %v5182_v2  ;;  %6356 = vmatpush3.msk.msra.mxu0 %vm429_vm0, %v5478_v3  ;;  %v5372_v15 = vld [vmem:[%s6990_s30 + $0x33] sm:$0xff]  ;;  %v288_v16 = vld [vmem:[%s6990_s30 + $0x28] sm:$0xff]  ;;  %v5373_v17 = vld [vmem:[%s6990_s30 + $0x3b] sm:$0xff] }
  0x16   : > { %6080 = vmatprep.mubr.msk.f32.mxu1 %vm320_vm1, %v285_v8  ;;  %6304 = vmatprep.mubr.msk.f32.mxu0 %vm320_vm1, %v5370_v9  ;;  %v289_v18 = vld [vmem:[%s6990_s30 + $0x30] sm:$0xff]  ;;  %v5374_v19 = vld [vmem:[%s6990_s30 + $0x43] sm:$0xff]  ;;  %v290_v20 = vld [vmem:[%s6990_s30 + $0x38] sm:$0xff] }
  0x17   : > { %6411 = vmatprep.subr.msk.mxu0 %vm429_vm0, %v7005_v10  ;;  %6187 = vmatprep.subr.msk.mxu1 %vm429_vm0, %v7010_v11  ;;  %v5375_v21 = vld [vmem:[%s6990_s30 + $0x4b] sm:$0xff]  ;;  %v291_v22 = vld [vmem:[%s6990_s30 + $0x40] sm:$0xff]  ;;  %v5376_v23 = vld [vmem:[%s6990_s30 + $0x53] sm:$0xff] }
  0x18   : > { %6081 = vmatmul.mubr.msk.f32.gmra.mrb[2].mxu1 %vm320_vm1, %v286_v12  ;;  %6305 = vmatmul.mubr.msk.f32.gmra.mrb[2].mxu0 %vm320_vm1, %v5371_v13  ;;  %v292_v24 = vld [vmem:[%s6990_s30 + $0x48] sm:$0xff]  ;;  %v5377_v25 = vld [vmem:[%s6990_s30 + $0x5b] sm:$0xff]  ;;  %v293_v26 = vld [vmem:[%s6990_s30 + $0x50] sm:$0xff] }
  0x19   : > { %6083 = vmatprep.mubr.msk.f32.mxu1 %vm320_vm1, %v287_v14  ;;  %6307 = vmatprep.mubr.msk.f32.mxu0 %vm320_vm1, %v5372_v15  ;;  %v5378_v27 = vld [vmem:[%s6990_s30 + $0x63] sm:$0xff]  ;;  %v294_v28 = vld [vmem:[%s6990_s30 + $0x58] sm:$0xff]  ;;  %v5379_v29 = vld [vmem:[%s6990_s30 + $0x6b] sm:$0xff] }
  0x1a   : > { %v295_v30 = vld [vmem:[%s6990_s30 + $0x60] sm:$0xff]  ;;  %v5380_v31 = vld [vmem:[%s6990_s30 + $0x73] sm:$0xff]  ;;  %v296_v32 = vld [vmem:[%s6990_s30 + $0x68] sm:$0xff] }
  0x1b   : > { %v5381_v33 = vld [vmem:[%s6990_s30 + $0x7b] sm:$0xff]  ;;  %v297_v34 = vld [vmem:[%s6990_s30 + $0x70] sm:$0xff]  ;;  %v5382_v35 = vld [vmem:[%s6990_s30 + $0x83] sm:$0xff] }
  0x1c   : > { %6084 = vmatmul.mubr.msk.f32.gmra.mrb[4].mxu1 %vm320_vm1, %v288_v16  ;;  %6308 = vmatmul.mubr.msk.f32.gmra.mrb[4].mxu0 %vm320_vm1, %v5373_v17  ;;  %v298_v36 = vld [vmem:[%s6990_s30 + $0x78] sm:$0xff]  ;;  %v5383_v37 = vld [vmem:[%s6990_s30 + $0x8b] sm:$0xff]  ;;  %v299_v38 = vld [vmem:[%s6990_s30 + $0x80] sm:$0xff] }
  0x1d   : > { %6086 = vmatprep.mubr.msk.f32.mxu1 %vm320_vm1, %v289_v18  ;;  %6310 = vmatprep.mubr.msk.f32.mxu0 %vm320_vm1, %v5374_v19  ;;  %v5384_v39 = vld [vmem:[%s6990_s30 + $0x93] sm:$0xff]  ;;  %v300_v40 = vld [vmem:[%s6990_s30 + $0x88] sm:$0xff]  ;;  %v5385_v41 = vld [vmem:[%s6990_s30 + $0x9b] sm:$0xff] }
  0x1e   : > { %v301_v42 = vld [vmem:[%s6990_s30 + $0x90] sm:$0xff]  ;;  %v302_v44 = vld [vmem:[%s6990_s30 + $0x98] sm:$0xff]  ;;  %v303_v46 = vld [vmem:[%s6990_s30 + $0xa0] sm:$0xff] }
  0x1f   : > { %v5442_v43 = vld [vmem:[%s6990_s30 + $0x14] sm:$0xff]  ;;  %v5443_v45 = vld [vmem:[%s6990_s30 + $0x1c] sm:$0xff]  ;;  %v7088_v47 = vld [vmem:[%s6990_s30 + $0x24] sm:$0xff] }
  0x20   : > { %6087 = vmatmul.mubr.msk.f32.gmra.mrb[6].mxu1 %vm320_vm1, %v290_v20  ;;  %6311 = vmatmul.mubr.msk.f32.gmra.mrb[6].mxu0 %vm320_vm1, %v5375_v21  ;;  %v304_v49 = vld [vmem:[%s6990_s30 + $0xa8] sm:$0xff]  ;;  %v305_v51 = vld [vmem:[%s6990_s30 + $0xb0] sm:$0xff]  ;;  %v306_v53 = vld [vmem:[%s6990_s30 + $0xb8] sm:$0xff] }
  0x21   : > { %6089 = vmatprep.mubr.msk.f32.mxu1 %vm320_vm1, %v291_v22  ;;  %6313 = vmatprep.mubr.msk.f32.mxu0 %vm320_vm1, %v5376_v23  ;;  %v7102_v50 = vld [vmem:[%s6990_s30 + $0x2c] sm:$0xff]  ;;  %v7108_v52 = vld [vmem:[%s6990_s30 + $0x34] sm:$0xff]  ;;  %v7120_v54 = vld [vmem:[%s6990_s30 + $0x3c] sm:$0xff] }
  0x22   : > { %v307_v55 = vld [vmem:[%s6990_s30 + $0xc0] sm:$0xff]  ;;  %v308_v57 = vld [vmem:[%s6990_s30 + $0xc8] sm:$0xff]  ;;  %v309_v59 = vld [vmem:[%s6990_s30 + $0xd0] sm:$0xff] }
  0x23   : > { %v7124_v56 = vld [vmem:[%s6990_s30 + $0x44] sm:$0xff]  ;;  %v7134_v58 = vld [vmem:[%s6990_s30 + $0x4c] sm:$0xff]  ;;  %v7138_v60 = vld [vmem:[%s6990_s30 + $0x54] sm:$0xff] }
  0x24   : > { %6090 = vmatmul.mubr.msk.f32.gmra.mrb[8].mxu1 %vm320_vm1, %v292_v24  ;;  %6314 = vmatmul.mubr.msk.f32.gmra.mrb[8].mxu0 %vm320_vm1, %v5377_v25  ;;  %v310_v61 = vld [vmem:[%s6990_s30 + $0xd8] sm:$0xff]  ;;  %v311_v63 = vld [vmem:[%s6990_s30 + $0xe0] sm:$0xff]  ;;  %v312_v2 = vld [vmem:[%s6990_s30 + $0xe8] sm:$0xff] }
  0x25   : > { %6092 = vmatprep.mubr.msk.f32.mxu1 %vm320_vm1, %v293_v26  ;;  %6316 = vmatprep.mubr.msk.f32.mxu0 %vm320_vm1, %v5378_v27  ;;  %v7148_v62 = vld [vmem:[%s6990_s30 + $0x5c] sm:$0xff]  ;;  %v7152_v0 = vld [vmem:[%s6990_s30 + $0x64] sm:$0xff]  ;;  %v7162_v3 = vld [vmem:[%s6990_s30 + $0x6c] sm:$0xff] }
  0x26   : > { %v313_v4 = vld [vmem:[%s6990_s30 + $0xf0] sm:$0xff]  ;;  %v314_v6 = vld [vmem:[%s6990_s30 + $0xf8] sm:$0xff]  ;;  %v315_v8 = vld [vmem:[%s6990_s30 + $0x100] sm:$0xff] }
  0x27   : > { %v7166_v5 = vld [vmem:[%s6990_s30 + $0x74] sm:$0xff]  ;;  %v7176_v7 = vld [vmem:[%s6990_s30 + $0x7c] sm:$0xff]  ;;  %v7180_v9 = vld [vmem:[%s6990_s30 + $0x84] sm:$0xff] }
  0x28   : > { %6093 = vmatmul.mubr.msk.f32.gmra.mrb[10].mxu1 %vm320_vm1, %v294_v28  ;;  %6317 = vmatmul.mubr.msk.f32.gmra.mrb[10].mxu0 %vm320_vm1, %v5379_v29  ;;  %v7190_v12 = vld [vmem:[%s6990_s30 + $0x8c] sm:$0xff]  ;;  %v7194_v14 = vld [vmem:[%s6990_s30 + $0x94] sm:$0xff]  ;;  %v7204_v16 = vld [vmem:[%s6990_s30 + $0x9c] sm:$0xff] }
  0x29   : > { %6095 = vmatprep.mubr.msk.f32.mxu1 %vm320_vm1, %v295_v30  ;;  %6319 = vmatprep.mubr.msk.f32.mxu0 %vm320_vm1, %v5380_v31  ;;  %v317_v13 = vld [vmem:[%s6990_s30 + $0x110] sm:$0xff]  ;;  %v318_v15 = vld [vmem:[%s6990_s30 + $0x118] sm:$0xff]  ;;  %v5146_v17 = vld [vmem:[%s6990_s30 + $0x1] sm:$0xff] }
  0x2a   : > { %v7208_v18 = vld [vmem:[%s6990_s30 + $0xa4] sm:$0xff]  ;;  %v7218_v20 = vld [vmem:[%s6990_s30 + $0xac] sm:$0xff]  ;;  %v7222_v22 = vld [vmem:[%s6990_s30 + $0xb4] sm:$0xff] }
  0x2b   : > { %v5147_v19 = vld [vmem:[%s6990_s30 + $0x9] sm:$0xff]  ;;  %v5148_v21 = vld [vmem:[%s6990_s30 + $0x11] sm:$0xff]  ;;  %v5149_v24 = vld [vmem:[%s6990_s30 + $0x19] sm:$0xff] }
  0x2c   : > { %6096 = vmatmul.mubr.msk.f32.gmra.mrb[12].mxu1 %vm320_vm1, %v296_v32  ;;  %6320 = vmatmul.mubr.msk.f32.gmra.mrb[12].mxu0 %vm320_vm1, %v5381_v33  ;;  %v7227_v23 = vld [vmem:[%s8053_s1 + $0xc] sm:$0xf]  ;;  %v7237_v25 = vld [vmem:[%s6990_s30 + $0xbc] sm:$0xff]  ;;  %v7243_v27 = vld [vmem:[%s6990_s30 + $0xc4] sm:$0xff] }
  0x2d   : > { %6098 = vmatprep.mubr.msk.f32.mxu1 %vm320_vm1, %v297_v34  ;;  %6322 = vmatprep.mubr.msk.f32.mxu0 %vm320_vm1, %v5382_v35  ;;  %v5150_v26 = vld [vmem:[%s6990_s30 + $0x21] sm:$0xff]  ;;  %v7255_v28 = vld [vmem:[%s6990_s30 + $0xcc] sm:$0xff]  ;;  %v7259_v30 = vld [vmem:[%s6990_s30 + $0xd4] sm:$0xff] }
  0x2e   : > { %v5152_v29 = vld [vmem:[%s6990_s30 + $0x31] sm:$0xff]  ;;  %v5153_v31 = vld [vmem:[%s6990_s30 + $0x39] sm:$0xff]  ;;  %v5154_v33 = vld [vmem:[%s6990_s30 + $0x41] sm:$0xff] }
  0x2f   : > { %v7269_v32 = vld [vmem:[%s6990_s30 + $0xdc] sm:$0xff]  ;;  %v7273_v34 = vld [vmem:[%s6990_s30 + $0xe4] sm:$0xff] }
  0x30   : > { %6099 = vmatmul.mubr.msk.f32.gmra.mrb[14].mxu1 %vm320_vm1, %v298_v36  ;;  %6323 = vmatmul.mubr.msk.f32.gmra.mrb[14].mxu0 %vm320_vm1, %v5383_v37  ;;  %v5155_v35 = vld [vmem:[%s6990_s30 + $0x49] sm:$0xff]  ;;  %v5156_v37 = vld [vmem:[%s6990_s30 + $0x51] sm:$0xff] }
  0x31   : > { %6101 = vmatprep.mubr.msk.f32.mxu1 %vm320_vm1, %v299_v38  ;;  %6325 = vmatprep.mubr.msk.f32.mxu0 %vm320_vm1, %v5384_v39  ;;  %v7283_v36 = vld [vmem:[%s6990_s30 + $0xec] sm:$0xff]  ;;  %v7287_v38 = vld [vmem:[%s6990_s30 + $0xf4] sm:$0xff] }
  0x32   : > { %v5157_v39 = vld [vmem:[%s6990_s30 + $0x59] sm:$0xff] }
  0x34   : > { %6102 = vmatmul.mubr.msk.f32.gmra.mrb[16].mxu1 %vm320_vm1, %v300_v40  ;;  %6326 = vmatmul.mubr.msk.f32.gmra.mrb[16].mxu0 %vm320_vm1, %v5385_v41  ;;  %v7297_v40 = vld [vmem:[%s6990_s30 + $0xfc] sm:$0xff] }
  0x35   : > { %6104 = vmatprep.mubr.msk.f32.mxu1 %vm320_vm1, %v301_v42  ;;  %6357 = vmatprep.mubr.msk.f32.mxu0 %vm320_vm1, %v5442_v43  ;;  %v5158_v41 = vld [vmem:[%s6990_s30 + $0x61] sm:$0xff]  ;;  %v5159_v43 = vld [vmem:[%s6990_s30 + $0x69] sm:$0xff] }
  0x36   : > { %v7301_v42 = vld [vmem:[%s6990_s30 + $0x104] sm:$0xff] }
  0x38   : > { %6105 = vmatmul.mubr.msk.f32.gmra.mrb[18].mxu1 %vm320_vm1, %v302_v44  ;;  %6358 = vmatmul.mubr.msk.f32.vlgmr.msra.gmra.mrb[0].mxu0 %vm320_vm1, %v5443_v45  ;;  %v7311_v44 = vld [vmem:[%s6990_s30 + $0x10c] sm:$0xff] }
  0x39   : > { %6412 = vmatpush3.msk.msra.mxu0 %vm429_vm0, %v7005_v10  ;;  %6107 = vmatprep.mubr.msk.f32.mxu1 %vm320_vm1, %v303_v46  ;;  %v316_v10 = vld [vmem:[%s6990_s30 + $0x108] sm:$0xff]  ;;  %v5160_v45 = vld [vmem:[%s6990_s30 + $0x71] sm:$0xff] }
  0x3a   : > { %6360 = vmatprep.mubr.msk.f32.mxu0 %vm320_vm1, %v7088_v47  ;;  %6467 = vmatprep.subr.msk.mxu0 %vm429_vm0, %v7093_v48  ;;  %v7315_v46 = vld [vmem:[%s6990_s30 + $0x114] sm:$0xff] }
  0x3c   : > { %6108 = vmatmul.mubr.msk.f32.gmra.mrb[20].mxu1 %vm320_vm1, %v304_v49  ;;  %6361 = vmatmul.mubr.msk.f32.gmra.mrb[2].mxu0 %vm320_vm1, %v7102_v50  ;;  %v5161_v49 = vld [vmem:[%s6990_s30 + $0x79] sm:$0xff] }
  0x3d   : > { %6110 = vmatprep.mubr.msk.f32.mxu1 %vm320_vm1, %v305_v51  ;;  %6363 = vmatprep.mubr.msk.f32.mxu0 %vm320_vm1, %v7108_v52  ;;  %v7325_v51 = vld [vmem:[%s6990_s30 + $0x11c] sm:$0xff] }
  0x40   : > { %6111 = vmatmul.mubr.msk.f32.gmra.mrb[22].mxu1 %vm320_vm1, %v306_v53  ;;  %6364 = vmatmul.mubr.msk.f32.gmra.mrb[4].mxu0 %vm320_vm1, %v7120_v54  ;;  %v5162_v53 = vld [vmem:[%s6990_s30 + $0x81] sm:$0xff] }
  0x41   : > { %6113 = vmatprep.mubr.msk.f32.mxu1 %vm320_vm1, %v307_v55  ;;  %6366 = vmatprep.mubr.msk.f32.mxu0 %vm320_vm1, %v7124_v56  ;;  %v7329_v55 = vld [vmem:[%s6990_s30 + $0x124] sm:$0xff] }
  0x44   : > { %6114 = vmatmul.mubr.msk.f32.gmra.mrb[24].mxu1 %vm320_vm1, %v308_v57  ;;  %6367 = vmatmul.mubr.msk.f32.gmra.mrb[6].mxu0 %vm320_vm1, %v7134_v58  ;;  %v5163_v57 = vld [vmem:[%s6990_s30 + $0x89] sm:$0xff] }
  0x45   : > { %6116 = vmatprep.mubr.msk.f32.mxu1 %vm320_vm1, %v309_v59  ;;  %6369 = vmatprep.mubr.msk.f32.mxu0 %vm320_vm1, %v7138_v60  ;;  %v7339_v59 = vld [vmem:[%s6990_s30 + $0x12c] sm:$0xff] }
  0x48   : > { %6117 = vmatmul.mubr.msk.f32.gmra.mrb[26].mxu1 %vm320_vm1, %v310_v61  ;;  %6370 = vmatmul.mubr.msk.f32.gmra.mrb[8].mxu0 %vm320_vm1, %v7148_v62  ;;  %v5164_v61 = vld [vmem:[%s6990_s30 + $0x91] sm:$0xff] }
  0x49   : > { %6119 = vmatprep.mubr.msk.f32.mxu1 %vm320_vm1, %v311_v63  ;;  %6372 = vmatprep.mubr.msk.f32.mxu0 %vm320_vm1, %v7152_v0  ;;  %v5165_v63 = vld [vmem:[%s6990_s30 + $0x99] sm:$0xff] }
  0x4c   : > { %6120 = vmatmul.mubr.msk.f32.gmra.mrb[28].mxu1 %vm320_vm1, %v312_v2  ;;  %6373 = vmatmul.mubr.msk.f32.gmra.mrb[10].mxu0 %vm320_vm1, %v7162_v3  ;;  %v5166_v2 = vld [vmem:[%s6990_s30 + $0xa1] sm:$0xff] }
  0x4d   : > { %6122 = vmatprep.mubr.msk.f32.mxu1 %vm320_vm1, %v313_v4  ;;  %6375 = vmatprep.mubr.msk.f32.mxu0 %vm320_vm1, %v7166_v5  ;;  %v7353_v4 = vld [vmem:[%s8053_s1 + $0x20] sm:$0xf] }
  0x50   : > { %6123 = vmatmul.mubr.msk.f32.gmra.mrb[30].mxu1 %vm320_vm1, %v314_v6  ;;  %6376 = vmatmul.mubr.msk.f32.gmra.mrb[12].mxu0 %vm320_vm1, %v7176_v7  ;;  %v5168_v6 = vld [vmem:[%s6990_s30 + $0xb1] sm:$0xff] }
  0x51   : > { %6125 = vmatprep.mubr.msk.f32.mxu1 %vm320_vm1, %v315_v8  ;;  %6378 = vmatprep.mubr.msk.f32.mxu0 %vm320_vm1, %v7180_v9  ;;  %v5181_v8 = vld [vmem:[%s6990_s30 + $0x119] sm:$0xff] }
  0x54   : > { %6126 = vmatmul.mubr.msk.f32.gmra.mrb[32].mxu1 %vm320_vm1, %v316_v10  ;;  %6379 = vmatmul.mubr.msk.f32.gmra.mrb[14].mxu0 %vm320_vm1, %v7190_v12  ;;  %v5221_v10 = vld [vmem:[%s6990_s30 + $0xa] sm:$0xff] }
  0x55   : > { %6128 = vmatprep.mubr.msk.f32.mxu1 %vm320_vm1, %v317_v13  ;;  %6381 = vmatprep.mubr.msk.f32.mxu0 %vm320_vm1, %v7194_v14  ;;  %v7441_v13 = vld [vmem:[%s6990_s30 + $0x1a] sm:$0xff] }
  0x58   : > { %6129 = vmatmul.mubr.msk.f32.gmra.mrb[34].mxu1 %vm320_vm1, %v318_v15  ;;  %6382 = vmatmul.mubr.msk.f32.gmra.mrb[16].mxu0 %vm320_vm1, %v7204_v16  ;;  %v7459_v15 = vld [vmem:[%s6990_s30 + $0x2a] sm:$0xff] }
  0x59   : > { %6133 = vmatprep.mubr.msk.f32.mxu1 %vm320_vm1, %v5146_v17  ;;  %6384 = vmatprep.mubr.msk.f32.mxu0 %vm320_vm1, %v7208_v18  ;;  %v7473_v17 = vld [vmem:[%s6990_s30 + $0x3a] sm:$0xff] }
  0x5c   : > { %6134 = vmatmul.mubr.msk.f32.vlgmr.msra.gmra.mrb[0].mxu1 %vm320_vm1, %v5147_v19  ;;  %6385 = vmatmul.mubr.msk.f32.gmra.mrb[18].mxu0 %vm320_vm1, %v7218_v20  ;;  %v7487_v19 = vld [vmem:[%s6990_s30 + $0x4a] sm:$0xff] }
  0x5d   : > { %6188 = vmatpush3.msk.msra.mxu1 %vm429_vm0, %v7010_v11  ;;  %6136 = vmatprep.mubr.msk.f32.mxu1 %vm320_vm1, %v5148_v21  ;;  %v5151_v11 = vld [vmem:[%s6990_s30 + $0x29] sm:$0xff]  ;;  %v7501_v21 = vld [vmem:[%s6990_s30 + $0x5a] sm:$0xff] }
  0x5e   : > { %6387 = vmatprep.mubr.msk.f32.mxu0 %vm320_vm1, %v7222_v22  ;;  %6243 = vmatprep.subr.msk.mxu1 %vm429_vm0, %v7227_v23 }
  0x60   : > { %6137 = vmatmul.mubr.msk.f32.gmra.mrb[2].mxu1 %vm320_vm1, %v5149_v24  ;;  %6388 = vmatmul.mubr.msk.f32.gmra.mrb[20].mxu0 %vm320_vm1, %v7237_v25  ;;  %v7518_v24 = vld [vmem:[%s6990_s30 + $0x72] sm:$0xff] }
  0x61   : > { %6139 = vmatprep.mubr.msk.f32.mxu1 %vm320_vm1, %v5150_v26  ;;  %6390 = vmatprep.mubr.msk.f32.mxu0 %vm320_vm1, %v7243_v27  ;;  %v7532_v26 = vld [vmem:[%s6990_s30 + $0x82] sm:$0xff] }
  0x64   : > { %6140 = vmatmul.mubr.msk.f32.gmra.mrb[4].mxu1 %vm320_vm1, %v5151_v11  ;;  %6391 = vmatmul.mubr.msk.f32.gmra.mrb[22].mxu0 %vm320_vm1, %v7255_v28  ;;  %v7543_v11 = vld [vmem:[%s6990_s30 + $0x8a] sm:$0xff] }
  0x65   : > { %6142 = vmatprep.mubr.msk.f32.mxu1 %vm320_vm1, %v5152_v29  ;;  %6393 = vmatprep.mubr.msk.f32.mxu0 %vm320_vm1, %v7259_v30  ;;  %v7547_v29 = vld [vmem:[%s6990_s30 + $0x92] sm:$0xff] }
  0x68   : > { %6143 = vmatmul.mubr.msk.f32.gmra.mrb[6].mxu1 %vm320_vm1, %v5153_v31  ;;  %6394 = vmatmul.mubr.msk.f32.gmra.mrb[24].mxu0 %vm320_vm1, %v7269_v32  ;;  %v7557_v31 = vld [vmem:[%s6990_s30 + $0x9a] sm:$0xff] }
  0x69   : > { %6145 = vmatprep.mubr.msk.f32.mxu1 %vm320_vm1, %v5154_v33  ;;  %6396 = vmatprep.mubr.msk.f32.mxu0 %vm320_vm1, %v7273_v34  ;;  %v7561_v33 = vld [vmem:[%s6990_s30 + $0xa2] sm:$0xff] }
  0x6c   : > { %6146 = vmatmul.mubr.msk.f32.gmra.mrb[8].mxu1 %vm320_vm1, %v5155_v35  ;;  %6397 = vmatmul.mubr.msk.f32.gmra.mrb[26].mxu0 %vm320_vm1, %v7283_v36  ;;  %v7572_v35 = vld [vmem:[%s6990_s30 + $0xaa] sm:$0xff] }
  0x6d   : > { %6148 = vmatprep.mubr.msk.f32.mxu1 %vm320_vm1, %v5156_v37  ;;  %6399 = vmatprep.mubr.msk.f32.mxu0 %vm320_vm1, %v7287_v38  ;;  %v7577_v37 = vld [vmem:[%s6990_s30 + $0xb2] sm:$0xff] }
  0x70   : > { %6149 = vmatmul.mubr.msk.f32.gmra.mrb[10].mxu1 %vm320_vm1, %v5157_v39  ;;  %6400 = vmatmul.mubr.msk.f32.gmra.mrb[28].mxu0 %vm320_vm1, %v7297_v40  ;;  %v7587_v39 = vld [vmem:[%s6990_s30 + $0xba] sm:$0xff] }
  0x71   : > { %6151 = vmatprep.mubr.msk.f32.mxu1 %vm320_vm1, %v5158_v41  ;;  %6402 = vmatprep.mubr.msk.f32.mxu0 %vm320_vm1, %v7301_v42  ;;  %v7591_v41 = vld [vmem:[%s6990_s30 + $0xc2] sm:$0xff] }
  0x74   : > { %6152 = vmatmul.mubr.msk.f32.gmra.mrb[12].mxu1 %vm320_vm1, %v5159_v43  ;;  %6403 = vmatmul.mubr.msk.f32.gmra.mrb[30].mxu0 %vm320_vm1, %v7311_v44  ;;  %v7601_v43 = vld [vmem:[%s6990_s30 + $0xca] sm:$0xff] }
  0x75   : > { %6154 = vmatprep.mubr.msk.f32.mxu1 %vm320_vm1, %v5160_v45  ;;  %6405 = vmatprep.mubr.msk.f32.mxu0 %vm320_vm1, %v7315_v46  ;;  %v7605_v45 = vld [vmem:[%s6990_s30 + $0xd2] sm:$0xff] }
  0x78   : > { %6155 = vmatmul.mubr.msk.f32.gmra.mrb[14].mxu1 %vm320_vm1, %v5161_v49  ;;  %6406 = vmatmul.mubr.msk.f32.gmra.mrb[32].mxu0 %vm320_vm1, %v7325_v51  ;;  %v7615_v49 = vld [vmem:[%s6990_s30 + $0xda] sm:$0xff] }
  0x79   : > { %6157 = vmatprep.mubr.msk.f32.mxu1 %vm320_vm1, %v5162_v53  ;;  %6408 = vmatprep.mubr.msk.f32.mxu0 %vm320_vm1, %v7329_v55  ;;  %v7619_v53 = vld [vmem:[%s6990_s30 + $0xe2] sm:$0xff] }
  0x7c   : > { %6158 = vmatmul.mubr.msk.f32.gmra.mrb[16].mxu1 %vm320_vm1, %v5163_v57  ;;  %6409 = vmatmul.mubr.msk.f32.gmra.mrb[34].mxu0 %vm320_vm1, %v7339_v59  ;;  %v7629_v57 = vld [vmem:[%s6990_s30 + $0xea] sm:$0xff] }
  0x7d   : > { %6160 = vmatprep.mubr.msk.f32.mxu1 %vm320_vm1, %v5164_v61  ;;  %6413 = vmatprep.mubr.msk.f32.mxu0 %vm320_vm1, %v7088_v47  ;;  %v5167_v47 = vld [vmem:[%s6990_s30 + $0xa9] sm:$0xff]  ;;  %v7633_v61 = vld [vmem:[%s6990_s30 + $0xf2] sm:$0xff] }
  0x80   : > { %6161 = vmatmul.mubr.msk.f32.gmra.mrb[18].mxu1 %vm320_vm1, %v5165_v63  ;;  %6414 = vmatmul.mubr.msk.f32.vlgmr.msra.gmra.mrb[0].mxu0 %vm320_vm1, %v7102_v50  ;;  %v5170_v50 = vld [vmem:[%s6990_s30 + $0xc1] sm:$0xff] }
  0x81   : > { %6468 = vmatpush3.msk.msra.mxu0 %vm429_vm0, %v7093_v48  ;;  %6163 = vmatprep.mubr.msk.f32.mxu1 %vm320_vm1, %v5166_v2  ;;  %v5169_v48 = vld [vmem:[%s6990_s30 + $0xb9] sm:$0xff]  ;;  %v5602_v63 = vld [vmem:[%s6990_s30 + $0x85] sm:$0xff] }
  0x82   : > { %6416 = vmatprep.mubr.msk.f32.mxu0 %vm320_vm1, %v7108_v52  ;;  %6523 = vmatprep.subr.msk.mxu0 %vm429_vm0, %v7353_v4  ;;  %v5171_v52 = vld [vmem:[%s6990_s30 + $0xc9] sm:$0xff]  ;;  %v7643_v2 = vld [vmem:[%s6990_s30 + $0xfa] sm:$0xff] }
  0x84   : > { %6164 = vmatmul.mubr.msk.f32.gmra.mrb[20].mxu1 %vm320_vm1, %v5167_v47  ;;  %6417 = vmatmul.mubr.msk.f32.gmra.mrb[2].mxu0 %vm320_vm1, %v7120_v54  ;;  %v5172_v54 = vld [vmem:[%s6990_s30 + $0xd1] sm:$0xff]  ;;  %v7647_v47 = vld [vmem:[%s6990_s30 + $0x102] sm:$0xff] }
  0x85   : > { %6166 = vmatprep.mubr.msk.f32.mxu1 %vm320_vm1, %v5168_v6  ;;  %6419 = vmatprep.mubr.msk.f32.mxu0 %vm320_vm1, %v7124_v56  ;;  %v5173_v56 = vld [vmem:[%s6990_s30 + $0xd9] sm:$0xff] }
  0x86   : > { %v5604_v6 = vld [vmem:[%s6990_s30 + $0x95] sm:$0xff] }
  0x88   : > { %6167 = vmatmul.mubr.msk.f32.gmra.mrb[22].mxu1 %vm320_vm1, %v5169_v48  ;;  %6420 = vmatmul.mubr.msk.f32.gmra.mrb[4].mxu0 %vm320_vm1, %v7134_v58  ;;  %v5174_v58 = vld [vmem:[%s6990_s30 + $0xe1] sm:$0xff]  ;;  %v7657_v48 = vld [vmem:[%s6990_s30 + $0x10a] sm:$0xff] }
  0x89   : > { %6169 = vmatprep.mubr.msk.f32.mxu1 %vm320_vm1, %v5170_v50  ;;  %6422 = vmatprep.mubr.msk.f32.mxu0 %vm320_vm1, %v7138_v60  ;;  %v5175_v60 = vld [vmem:[%s6990_s30 + $0xe9] sm:$0xff]  ;;  %v5605_v50 = vld [vmem:[%s6990_s30 + $0x9d] sm:$0xff] }
  0x8c   : > { %6170 = vmatmul.mubr.msk.f32.gmra.mrb[24].mxu1 %vm320_vm1, %v5171_v52  ;;  %6423 = vmatmul.mubr.msk.f32.gmra.mrb[6].mxu0 %vm320_vm1, %v7148_v62  ;;  %v5176_v62 = vld [vmem:[%s6990_s30 + $0xf1] sm:$0xff] }
  0x8d   : > { %6172 = vmatprep.mubr.msk.f32.mxu1 %vm320_vm1, %v5172_v54  ;;  %6425 = vmatprep.mubr.msk.f32.mxu0 %vm320_vm1, %v7152_v0  ;;  %v5177_v0 = vld [vmem:[%s6990_s30 + $0xf9] sm:$0xff]  ;;  %v5606_v54 = vld [vmem:[%s6990_s30 + $0xa5] sm:$0xff] }
  0x8e   : > { %v7661_v52 = vld [vmem:[%s6990_s30 + $0x112] sm:$0xff] }
  0x90   : > { %6173 = vmatmul.mubr.msk.f32.gmra.mrb[26].mxu1 %vm320_vm1, %v5173_v56  ;;  %6426 = vmatmul.mubr.msk.f32.gmra.mrb[8].mxu0 %vm320_vm1, %v7162_v3  ;;  %v5178_v3 = vld [vmem:[%s6990_s30 + $0x101] sm:$0xff] }
  0x91   : > { %6175 = vmatprep.mubr.msk.f32.mxu1 %vm320_vm1, %v5174_v58  ;;  %6428 = vmatprep.mubr.msk.f32.mxu0 %vm320_vm1, %v7166_v5  ;;  %v5179_v5 = vld [vmem:[%s6990_s30 + $0x109] sm:$0xff]  ;;  %v7671_v56 = vld [vmem:[%s6990_s30 + $0x11a] sm:$0xff] }
  0x92   : > { %v5607_v58 = vld [vmem:[%s6990_s30 + $0xad] sm:$0xff] }
  0x94   : > { %6176 = vmatmul.mubr.msk.f32.gmra.mrb[28].mxu1 %vm320_vm1, %v5175_v60  ;;  %6429 = vmatmul.mubr.msk.f32.gmra.mrb[10].mxu0 %vm320_vm1, %v7176_v7  ;;  %v5180_v7 = vld [vmem:[%s6990_s30 + $0x111] sm:$0xff] }
  0x95   : > { %6178 = vmatprep.mubr.msk.f32.mxu1 %vm320_vm1, %v5176_v62  ;;  %6431 = vmatprep.mubr.msk.f32.mxu0 %vm320_vm1, %v7180_v9  ;;  %v5220_v9 = vld [vmem:[%s6990_s30 + $0x2] sm:$0xff]  ;;  %v5608_v60 = vld [vmem:[%s6990_s30 + $0xb5] sm:$0xff] }
  0x96   : > { %v5609_v62 = vld [vmem:[%s6990_s30 + $0xbd] sm:$0xff] }
  0x98   : > { %6179 = vmatmul.mubr.msk.f32.gmra.mrb[30].mxu1 %vm320_vm1, %v5177_v0  ;;  %6432 = vmatmul.mubr.msk.f32.gmra.mrb[12].mxu0 %vm320_vm1, %v7190_v12  ;;  %v7431_v12 = vld [vmem:[%s6990_s30 + $0x12] sm:$0xff]  ;;  %v5610_v0 = vld [vmem:[%s6990_s30 + $0xc5] sm:$0xff] }
  0x99   : > { %6181 = vmatprep.mubr.msk.f32.mxu1 %vm320_vm1, %v5178_v3  ;;  %6434 = vmatprep.mubr.msk.f32.mxu0 %vm320_vm1, %v7194_v14  ;;  %v7446_v14 = vld [vmem:[%s6990_s30 + $0x22] sm:$0xff]  ;;  %v5611_v3 = vld [vmem:[%s6990_s30 + $0xcd] sm:$0xff] }
  0x9c   : > { %6182 = vmatmul.mubr.msk.f32.gmra.mrb[32].mxu1 %vm320_vm1, %v5179_v5  ;;  %6435 = vmatmul.mubr.msk.f32.gmra.mrb[14].mxu0 %vm320_vm1, %v7204_v16  ;;  %v7462_v16 = vld [vmem:[%s6990_s30 + $0x32] sm:$0xff] }
  0x9d   : > { %6184 = vmatprep.mubr.msk.f32.mxu1 %vm320_vm1, %v5180_v7  ;;  %6437 = vmatprep.mubr.msk.f32.mxu0 %vm320_vm1, %v7208_v18  ;;  %v7476_v18 = vld [vmem:[%s6990_s30 + $0x42] sm:$0xff]  ;;  %v5612_v5 = vld [vmem:[%s6990_s30 + $0xd5] sm:$0xff] }
  0x9e   : > { %v5614_v7 = vld [vmem:[%s6990_s30 + $0xe5] sm:$0xff] }
  0xa0   : > { %6185 = vmatmul.mubr.msk.f32.gmra.mrb[34].mxu1 %vm320_vm1, %v5181_v8  ;;  %6438 = vmatmul.mubr.msk.f32.gmra.mrb[16].mxu0 %vm320_vm1, %v7218_v20  ;;  %v7490_v20 = vld [vmem:[%s6990_s30 + $0x52] sm:$0xff] }
  0xa1   : > { %6189 = vmatprep.mubr.msk.f32.mxu1 %vm320_vm1, %v5220_v9  ;;  %6440 = vmatprep.mubr.msk.f32.mxu0 %vm320_vm1, %v7222_v22  ;;  %v7504_v22 = vld [vmem:[%s6990_s30 + $0x62] sm:$0xff]  ;;  %v5615_v8 = vld [vmem:[%s6990_s30 + $0xed] sm:$0xff]  ;;  %v5616_v9 = vld [vmem:[%s6990_s30 + $0xf5] sm:$0xff] }
  0xa4   : > { %6190 = vmatmul.mubr.msk.f32.vlgmr.msra.gmra.mrb[0].mxu1 %vm320_vm1, %v5221_v10  ;;  %6441 = vmatmul.mubr.msk.f32.gmra.mrb[18].mxu0 %vm320_vm1, %v7237_v25  ;;  %v7529_v25 = vld [vmem:[%s6990_s30 + $0x7a] sm:$0xff] }
  0xa5   : > { %6244 = vmatpush3.msk.msra.mxu1 %vm429_vm0, %v7227_v23  ;;  %6192 = vmatprep.mubr.msk.f32.mxu1 %vm320_vm1, %v7431_v12  ;;  %v7515_v23 = vld [vmem:[%s6990_s30 + $0x6a] sm:$0xff]  ;;  %v5617_v10 = vld [vmem:[%s6990_s30 + $0xfd] sm:$0xff] }
  0xa6   : > { %6443 = vmatprep.mubr.msk.f32.mxu0 %vm320_vm1, %v7243_v27  ;;  %6579 = vmatprep.subr.msk.mxu1 %vm429_vm0, %v6968_v1  ;;  %v5550_v27 = vld [vmem:[%s6990_s30 + $0x134] sm:$0xff] }
  0xa8   : > { %6193 = vmatmul.mubr.msk.f32.gmra.mrb[2].mxu1 %vm320_vm1, %v7441_v13  ;;  %6444 = vmatmul.mubr.msk.f32.gmra.mrb[20].mxu0 %vm320_vm1, %v7255_v28  ;;  %v5551_v28 = vld [vmem:[%s6990_s30 + $0x13c] sm:$0xff] }
  0xa9   : > { %6195 = vmatprep.mubr.msk.f32.mxu1 %vm320_vm1, %v7446_v14  ;;  %6446 = vmatprep.mubr.msk.f32.mxu0 %vm320_vm1, %v7259_v30  ;;  %v5590_v30 = vld [vmem:[%s6990_s30 + $0x25] sm:$0xff] }
  0xac   : > { %6196 = vmatmul.mubr.msk.f32.gmra.mrb[4].mxu1 %vm320_vm1, %v7459_v15  ;;  %6447 = vmatmul.mubr.msk.f32.gmra.mrb[22].mxu0 %vm320_vm1, %v7269_v32  ;;  %v5591_v32 = vld [vmem:[%s6990_s30 + $0x2d] sm:$0xff] }
  0xad   : > { %6198 = vmatprep.mubr.msk.f32.mxu1 %vm320_vm1, %v7462_v16  ;;  %6449 = vmatprep.mubr.msk.f32.mxu0 %vm320_vm1, %v7273_v34  ;;  %v5592_v34 = vld [vmem:[%s6990_s30 + $0x35] sm:$0xff] }
  0xb0   : > { %6199 = vmatmul.mubr.msk.f32.gmra.mrb[6].mxu1 %vm320_vm1, %v7473_v17  ;;  %6450 = vmatmul.mubr.msk.f32.gmra.mrb[24].mxu0 %vm320_vm1, %v7283_v36  ;;  %v5593_v36 = vld [vmem:[%s6990_s30 + $0x3d] sm:$0xff] }
  0xb1   : > { %6201 = vmatprep.mubr.msk.f32.mxu1 %vm320_vm1, %v7476_v18  ;;  %6452 = vmatprep.mubr.msk.f32.mxu0 %vm320_vm1, %v7287_v38  ;;  %v5594_v38 = vld [vmem:[%s6990_s30 + $0x45] sm:$0xff] }
  0xb4   : > { %6202 = vmatmul.mubr.msk.f32.gmra.mrb[8].mxu1 %vm320_vm1, %v7487_v19  ;;  %6453 = vmatmul.mubr.msk.f32.gmra.mrb[26].mxu0 %vm320_vm1, %v7297_v40  ;;  %v5595_v40 = vld [vmem:[%s6990_s30 + $0x4d] sm:$0xff] }
  0xb5   : > { %6204 = vmatprep.mubr.msk.f32.mxu1 %vm320_vm1, %v7490_v20  ;;  %6455 = vmatprep.mubr.msk.f32.mxu0 %vm320_vm1, %v7301_v42  ;;  %v5596_v42 = vld [vmem:[%s6990_s30 + $0x55] sm:$0xff] }
  0xb8   : > { %6205 = vmatmul.mubr.msk.f32.gmra.mrb[10].mxu1 %vm320_vm1, %v7501_v21  ;;  %6456 = vmatmul.mubr.msk.f32.gmra.mrb[28].mxu0 %vm320_vm1, %v7311_v44  ;;  %v5597_v44 = vld [vmem:[%s6990_s30 + $0x5d] sm:$0xff] }
  0xb9   : > { %6207 = vmatprep.mubr.msk.f32.mxu1 %vm320_vm1, %v7504_v22  ;;  %6458 = vmatprep.mubr.msk.f32.mxu0 %vm320_vm1, %v7315_v46  ;;  %v5598_v46 = vld [vmem:[%s6990_s30 + $0x65] sm:$0xff] }
  0xbc   : > { %6208 = vmatmul.mubr.msk.f32.gmra.mrb[12].mxu1 %vm320_vm1, %v7515_v23  ;;  %6459 = vmatmul.mubr.msk.f32.gmra.mrb[30].mxu0 %vm320_vm1, %v7325_v51  ;;  %v5599_v51 = vld [vmem:[%s6990_s30 + $0x6d] sm:$0xff] }
  0xbd   : > { %6210 = vmatprep.mubr.msk.f32.mxu1 %vm320_vm1, %v7518_v24  ;;  %6461 = vmatprep.mubr.msk.f32.mxu0 %vm320_vm1, %v7329_v55  ;;  %v5600_v55 = vld [vmem:[%s6990_s30 + $0x75] sm:$0xff] }
  0xc0   : > { %6211 = vmatmul.mubr.msk.f32.gmra.mrb[14].mxu1 %vm320_vm1, %v7529_v25  ;;  %6462 = vmatmul.mubr.msk.f32.gmra.mrb[32].mxu0 %vm320_vm1, %v7339_v59  ;;  %v5601_v59 = vld [vmem:[%s6990_s30 + $0x7d] sm:$0xff] }
  0xc1   : > { %6213 = vmatprep.mubr.msk.f32.mxu1 %vm320_vm1, %v7532_v26  ;;  %6464 = vmatprep.mubr.msk.f32.mxu0 %vm320_vm1, %v5550_v27  ;;  %v5671_v27 = vld [vmem:[%s6990_s30 + $0x5e] sm:$0xff] }
  0xc4   : > { %6214 = vmatmul.mubr.msk.f32.gmra.mrb[16].mxu1 %vm320_vm1, %v7543_v11  ;;  %6465 = vmatmul.mubr.msk.f32.gmra.mrb[34].mxu0 %vm320_vm1, %v5551_v28  ;;  %v5673_v28 = vld [vmem:[%s6990_s30 + $0x6e] sm:$0xff] }
  0xc5   : > { %6216 = vmatprep.mubr.msk.f32.mxu1 %vm320_vm1, %v7547_v29  ;;  %6469 = vmatprep.mubr.msk.f32.mxu0 %vm320_vm1, %v5590_v30  ;;  %v5675_v30 = vld [vmem:[%s6990_s30 + $0x7e] sm:$0xff] }
  0xc8   : > { %6217 = vmatmul.mubr.msk.f32.gmra.mrb[18].mxu1 %vm320_vm1, %v7557_v31  ;;  %6470 = vmatmul.mubr.msk.f32.vlgmr.msra.gmra.mrb[0].mxu0 %vm320_vm1, %v5591_v32  ;;  %v5677_v32 = vld [vmem:[%s6990_s30 + $0x8e] sm:$0xff] }
  0xc9   : > { %6524 = vmatpush3.msk.msra.mxu0 %vm429_vm0, %v7353_v4  ;;  %6219 = vmatprep.mubr.msk.f32.mxu1 %vm320_vm1, %v7561_v33  ;;  %v5603_v4 = vld [vmem:[%s6990_s30 + $0x8d] sm:$0xff] }
  0xca   : > { %6472 = vmatprep.mubr.msk.f32.mxu0 %vm320_vm1, %v5592_v34  ;;  %v5679_v34 = vld [vmem:[%s6990_s30 + $0x9e] sm:$0xff] }
  0xcc   : > { %6220 = vmatmul.mubr.msk.f32.gmra.mrb[20].mxu1 %vm320_vm1, %v7572_v35  ;;  %6473 = vmatmul.mubr.msk.f32.gmra.mrb[2].mxu0 %vm320_vm1, %v5593_v36  ;;  %v5680_v36 = vld [vmem:[%s6990_s30 + $0xa6] sm:$0xff] }
  0xcd   : > { %6222 = vmatprep.mubr.msk.f32.mxu1 %vm320_vm1, %v7577_v37  ;;  %6475 = vmatprep.mubr.msk.f32.mxu0 %vm320_vm1, %v5594_v38  ;;  %v5681_v38 = vld [vmem:[%s6990_s30 + $0xae] sm:$0xff] }
  0xd0   : > { %6223 = vmatmul.mubr.msk.f32.gmra.mrb[22].mxu1 %vm320_vm1, %v7587_v39  ;;  %6476 = vmatmul.mubr.msk.f32.gmra.mrb[4].mxu0 %vm320_vm1, %v5595_v40  ;;  %v5682_v40 = vld [vmem:[%s6990_s30 + $0xb6] sm:$0xff] }
  0xd1   : > { %6225 = vmatprep.mubr.msk.f32.mxu1 %vm320_vm1, %v7591_v41  ;;  %6478 = vmatprep.mubr.msk.f32.mxu0 %vm320_vm1, %v5596_v42  ;;  %v5683_v42 = vld [vmem:[%s6990_s30 + $0xbe] sm:$0xff] }
  0xd4   : > { %6226 = vmatmul.mubr.msk.f32.gmra.mrb[24].mxu1 %vm320_vm1, %v7601_v43  ;;  %6479 = vmatmul.mubr.msk.f32.gmra.mrb[6].mxu0 %vm320_vm1, %v5597_v44  ;;  %v5684_v44 = vld [vmem:[%s6990_s30 + $0xc6] sm:$0xff] }
  0xd5   : > { %6228 = vmatprep.mubr.msk.f32.mxu1 %vm320_vm1, %v7605_v45  ;;  %6481 = vmatprep.mubr.msk.f32.mxu0 %vm320_vm1, %v5598_v46  ;;  %v5685_v46 = vld [vmem:[%s6990_s30 + $0xce] sm:$0xff] }
  0xd8   : > { %6229 = vmatmul.mubr.msk.f32.gmra.mrb[26].mxu1 %vm320_vm1, %v7615_v49  ;;  %6482 = vmatmul.mubr.msk.f32.gmra.mrb[8].mxu0 %vm320_vm1, %v5599_v51  ;;  %v5686_v51 = vld [vmem:[%s6990_s30 + $0xd6] sm:$0xff] }
  0xd9   : > { %6231 = vmatprep.mubr.msk.f32.mxu1 %vm320_vm1, %v7619_v53  ;;  %6484 = vmatprep.mubr.msk.f32.mxu0 %vm320_vm1, %v5600_v55  ;;  %v5687_v55 = vld [vmem:[%s6990_s30 + $0xde] sm:$0xff] }
  0xdc   : > { %6232 = vmatmul.mubr.msk.f32.gmra.mrb[28].mxu1 %vm320_vm1, %v7629_v57  ;;  %6485 = vmatmul.mubr.msk.f32.gmra.mrb[10].mxu0 %vm320_vm1, %v5601_v59  ;;  %v5688_v59 = vld [vmem:[%s6990_s30 + $0xe6] sm:$0xff] }
  0xdd   : > { %6234 = vmatprep.mubr.msk.f32.mxu1 %vm320_vm1, %v7633_v61  ;;  %6487 = vmatprep.mubr.msk.f32.mxu0 %vm320_vm1, %v5602_v63  ;;  %v5689_v63 = vld [vmem:[%s6990_s30 + $0xee] sm:$0xff] }
  0xe0   : > { %6235 = vmatmul.mubr.msk.f32.gmra.mrb[30].mxu1 %vm320_vm1, %v7643_v2  ;;  %6488 = vmatmul.mubr.msk.f32.gmra.mrb[12].mxu0 %vm320_vm1, %v5603_v4  ;;  %v5690_v4 = vld [vmem:[%s6990_s30 + $0xf6] sm:$0xff] }
  0xe1   : > { %6237 = vmatprep.mubr.msk.f32.mxu1 %vm320_vm1, %v7647_v47  ;;  %6490 = vmatprep.mubr.msk.f32.mxu0 %vm320_vm1, %v5604_v6  ;;  %v5691_v6 = vld [vmem:[%s6990_s30 + $0xfe] sm:$0xff] }
  0xe4   : > { %6238 = vmatmul.mubr.msk.f32.gmra.mrb[32].mxu1 %vm320_vm1, %v7657_v48  ;;  %6491 = vmatmul.mubr.msk.f32.gmra.mrb[14].mxu0 %vm320_vm1, %v5605_v50  ;;  %v5692_v50 = vld [vmem:[%s6990_s30 + $0x106] sm:$0xff] }
  0xe5   : > { %6240 = vmatprep.mubr.msk.f32.mxu1 %vm320_vm1, %v7661_v52  ;;  %6493 = vmatprep.mubr.msk.f32.mxu0 %vm320_vm1, %v5606_v54  ;;  %v5693_v54 = vld [vmem:[%s6990_s30 + $0x10e] sm:$0xff] }
  0xe8   : > { %6241 = vmatmul.mubr.msk.f32.gmra.mrb[34].mxu1 %vm320_vm1, %v7671_v56  ;;  %6494 = vmatmul.mubr.msk.f32.gmra.mrb[16].mxu0 %vm320_vm1, %v5607_v58  ;;  %v5694_v58 = vld [vmem:[%s6990_s30 + $0x116] sm:$0xff] }
  0xe9   : > { %6245 = vmatprep.mubr.msk.f32.mxu1 %vm320_vm1, %v7431_v12  ;;  %6496 = vmatprep.mubr.msk.f32.mxu0 %vm320_vm1, %v5608_v60  ;;  %v5618_v12 = vld [vmem:[%s6990_s30 + $0x105] sm:$0xff] }
  0xea   : > { %v5399_v60 = vld [vmem:[%s6990_s30 + $0x10b] sm:$0xff] }
  0xec   : > { %6246 = vmatmul.mubr.msk.f32.vlgmr.msra.gmra.mrb[0].mxu1 %vm320_vm1, %v7441_v13  ;;  %6497 = vmatmul.mubr.msk.f32.gmra.mrb[18].mxu0 %vm320_vm1, %v5609_v62  ;;  %v5619_v13 = vld [vmem:[%s6990_s30 + $0x10d] sm:$0xff]  ;;  %v5695_v62 = vld [vmem:[%s6990_s30 + $0x11e] sm:$0xff] }
  0xed   : > { %6580 = vmatpush3.msk.msra.mxu1 %vm429_vm0, %v6968_v1  ;;  %6248 = vmatprep.mubr.msk.f32.mxu1 %vm320_vm1, %v7446_v14  ;;  %v5613_v1 = vld [vmem:[%s6990_s30 + $0xdd] sm:$0xff]  ;;  %v5620_v14 = vld [vmem:[%s6990_s30 + $0x115] sm:$0xff] }
  0xee   : > { %6499 = vmatprep.mubr.msk.f32.mxu0 %vm320_vm1, %v5610_v0  ;;  %v5400_v0 = vld [vmem:[%s6990_s30 + $0x113] sm:$0xff] }
  0xf0   : > { %6249 = vmatmul.mubr.msk.f32.gmra.mrb[2].mxu1 %vm320_vm1, %v7459_v15  ;;  %6500 = vmatmul.mubr.msk.f32.gmra.mrb[20].mxu0 %vm320_vm1, %v5611_v3  ;;  %v5621_v15 = vld [vmem:[%s6990_s30 + $0x11d] sm:$0xff]  ;;  %v5696_v3 = vld [vmem:[%s6990_s30 + $0x126] sm:$0xff] }
  0xf1   : > { %6251 = vmatprep.mubr.msk.f32.mxu1 %vm320_vm1, %v7462_v16  ;;  %6502 = vmatprep.mubr.msk.f32.mxu0 %vm320_vm1, %v5612_v5  ;;  %v5622_v16 = vld [vmem:[%s6990_s30 + $0x125] sm:$0xff]  ;;  %v5401_v5 = vld [vmem:[%s6990_s30 + $0x11b] sm:$0xff] }
  0xf4   : > { %6252 = vmatmul.mubr.msk.f32.gmra.mrb[4].mxu1 %vm320_vm1, %v7473_v17  ;;  %6503 = vmatmul.mubr.msk.f32.gmra.mrb[22].mxu0 %vm320_vm1, %v5613_v1  ;;  %v5623_v17 = vld [vmem:[%s6990_s30 + $0x12d] sm:$0xff] }
  0xf5   : > { %6254 = vmatprep.mubr.msk.f32.mxu1 %vm320_vm1, %v7476_v18  ;;  %6505 = vmatprep.mubr.msk.f32.mxu0 %vm320_vm1, %v5614_v7  ;;  %v5624_v18 = vld [vmem:[%s6990_s30 + $0x135] sm:$0xff]  ;;  %v5402_v7 = vld [vmem:[%s6990_s30 + $0x123] sm:$0xff] }
  0xf6   : > { %v5697_v1 = vld [vmem:[%s6990_s30 + $0x12e] sm:$0xff] }
  0xf8   : > { %6255 = vmatmul.mubr.msk.f32.gmra.mrb[6].mxu1 %vm320_vm1, %v7487_v19  ;;  %6506 = vmatmul.mubr.msk.f32.gmra.mrb[24].mxu0 %vm320_vm1, %v5615_v8  ;;  %v5625_v19 = vld [vmem:[%s6990_s30 + $0x13d] sm:$0xff] }
  0xf9   : > { %6257 = vmatprep.mubr.msk.f32.mxu1 %vm320_vm1, %v7490_v20  ;;  %6508 = vmatprep.mubr.msk.f32.mxu0 %vm320_vm1, %v5616_v9  ;;  %v5664_v20 = vld [vmem:[%s6990_s30 + $0x26] sm:$0xff]  ;;  %v5698_v8 = vld [vmem:[%s6990_s30 + $0x136] sm:$0xff] }
  0xfa   : > { %v5403_v9 = vld [vmem:[%s6990_s30 + $0x12b] sm:$0xff] }
  0xfc   : > { %6258 = vmatmul.mubr.msk.f32.gmra.mrb[8].mxu1 %vm320_vm1, %v7501_v21  ;;  %6509 = vmatmul.mubr.msk.f32.gmra.mrb[26].mxu0 %vm320_vm1, %v5617_v10  ;;  %v5665_v21 = vld [vmem:[%s6990_s30 + $0x2e] sm:$0xff]  ;;  %v5699_v10 = vld [vmem:[%s6990_s30 + $0x13e] sm:$0xff] }
  0xfd   : > { %6260 = vmatprep.mubr.msk.f32.mxu1 %vm320_vm1, %v7504_v22  ;;  %6511 = vmatprep.mubr.msk.f32.mxu0 %vm320_vm1, %v5618_v12  ;;  %v5666_v22 = vld [vmem:[%s6990_s30 + $0x36] sm:$0xff] }
 0x100   : > { %6261 = vmatmul.mubr.msk.f32.gmra.mrb[10].mxu1 %vm320_vm1, %v7515_v23  ;;  %6512 = vmatmul.mubr.msk.f32.gmra.mrb[28].mxu0 %vm320_vm1, %v5619_v13  ;;  %v5667_v23 = vld [vmem:[%s6990_s30 + $0x3e] sm:$0xff] }
 0x101   : > { %6263 = vmatprep.mubr.msk.f32.mxu1 %vm320_vm1, %v7518_v24  ;;  %6514 = vmatprep.mubr.msk.f32.mxu0 %vm320_vm1, %v5620_v14  ;;  %v5668_v24 = vld [vmem:[%s6990_s30 + $0x46] sm:$0xff] }
 0x104   : > { %6264 = vmatmul.mubr.msk.f32.gmra.mrb[12].mxu1 %vm320_vm1, %v7529_v25  ;;  %6515 = vmatmul.mubr.msk.f32.gmra.mrb[30].mxu0 %vm320_vm1, %v5621_v15  ;;  %v5669_v25 = vld [vmem:[%s6990_s30 + $0x4e] sm:$0xff] }
 0x105   : > { %6266 = vmatprep.mubr.msk.f32.mxu1 %vm320_vm1, %v7532_v26  ;;  %6517 = vmatprep.mubr.msk.f32.mxu0 %vm320_vm1, %v5622_v16  ;;  %v5670_v26 = vld [vmem:[%s6990_s30 + $0x56] sm:$0xff] }
 0x108   : > { %6267 = vmatmul.mubr.msk.f32.gmra.mrb[14].mxu1 %vm320_vm1, %v7543_v11  ;;  %6518 = vmatmul.mubr.msk.f32.gmra.mrb[32].mxu0 %vm320_vm1, %v5623_v17  ;;  %v5672_v11 = vld [vmem:[%s6990_s30 + $0x66] sm:$0xff] }
 0x109   : > { %6269 = vmatprep.mubr.msk.f32.mxu1 %vm320_vm1, %v7547_v29  ;;  %6520 = vmatprep.mubr.msk.f32.mxu0 %vm320_vm1, %v5624_v18  ;;  %v5674_v29 = vld [vmem:[%s6990_s30 + $0x76] sm:$0xff] }
 0x10c   : > { %6270 = vmatmul.mubr.msk.f32.gmra.mrb[16].mxu1 %vm320_vm1, %v7557_v31  ;;  %6521 = vmatmul.mubr.msk.f32.gmra.mrb[34].mxu0 %vm320_vm1, %v5625_v19  ;;  %v5676_v31 = vld [vmem:[%s6990_s30 + $0x86] sm:$0xff] }
 0x10d   : > { %6272 = vmatprep.mubr.msk.f32.mxu1 %vm320_vm1, %v7561_v33  ;;  %6525 = vmatprep.mubr.msk.f32.mxu0 %vm320_vm1, %v5664_v20  ;;  %v5678_v33 = vld [vmem:[%s6990_s30 + $0x96] sm:$0xff] }
 0x110   : > { %6273 = vmatmul.mubr.msk.f32.gmra.mrb[18].mxu1 %vm320_vm1, %v7572_v35  ;;  %6526 = vmatmul.mubr.msk.f32.vlgmr.msra.gmra.mrb[0].mxu0 %vm320_vm1, %v5665_v21  ;;  %v5328_v35 = vld [vmem:[%s6990_s30 + $0x122] sm:$0xff] }
 0x111   : > { %6275 = vmatprep.mubr.msk.f32.mxu1 %vm320_vm1, %v7577_v37  ;;  %6528 = vmatprep.mubr.msk.f32.mxu0 %vm320_vm1, %v5666_v22  ;;  %v5329_v37 = vld [vmem:[%s6990_s30 + $0x12a] sm:$0xff] }
 0x114   : > { %6276 = vmatmul.mubr.msk.f32.gmra.mrb[20].mxu1 %vm320_vm1, %v7587_v39  ;;  %6529 = vmatmul.mubr.msk.f32.gmra.mrb[2].mxu0 %vm320_vm1, %v5667_v23  ;;  %v5386_v39 = vld [vmem:[%s6990_s30 + $0xa3] sm:$0xff] }
 0x115   : > { %6278 = vmatprep.mubr.msk.f32.mxu1 %vm320_vm1, %v7591_v41  ;;  %6531 = vmatprep.mubr.msk.f32.mxu0 %vm320_vm1, %v5668_v24  ;;  %v5387_v41 = vld [vmem:[%s6990_s30 + $0xab] sm:$0xff] }
 0x118   : > { %6279 = vmatmul.mubr.msk.f32.gmra.mrb[22].mxu1 %vm320_vm1, %v7601_v43  ;;  %6532 = vmatmul.mubr.msk.f32.gmra.mrb[4].mxu0 %vm320_vm1, %v5669_v25  ;;  %v5388_v43 = vld [vmem:[%s6990_s30 + $0xb3] sm:$0xff] }
 0x119   : > { %6281 = vmatprep.mubr.msk.f32.mxu1 %vm320_vm1, %v7605_v45  ;;  %6534 = vmatprep.mubr.msk.f32.mxu0 %vm320_vm1, %v5670_v26  ;;  %v5389_v45 = vld [vmem:[%s6990_s30 + $0xbb] sm:$0xff] }
 0x11c   : > { %6282 = vmatmul.mubr.msk.f32.gmra.mrb[24].mxu1 %vm320_vm1, %v7615_v49  ;;  %6535 = vmatmul.mubr.msk.f32.gmra.mrb[6].mxu0 %vm320_vm1, %v5671_v27  ;;  %v5390_v49 = vld [vmem:[%s6990_s30 + $0xc3] sm:$0xff] }
 0x11d   : > { %6284 = vmatprep.mubr.msk.f32.mxu1 %vm320_vm1, %v7619_v53  ;;  %6537 = vmatprep.mubr.msk.f32.mxu0 %vm320_vm1, %v5672_v11  ;;  %v5391_v53 = vld [vmem:[%s6990_s30 + $0xcb] sm:$0xff] }
 0x120   : > { %6285 = vmatmul.mubr.msk.f32.gmra.mrb[26].mxu1 %vm320_vm1, %v7629_v57  ;;  %6538 = vmatmul.mubr.msk.f32.gmra.mrb[8].mxu0 %vm320_vm1, %v5673_v28  ;;  %v5392_v57 = vld [vmem:[%s6990_s30 + $0xd3] sm:$0xff] }
 0x121   : > { %6287 = vmatprep.mubr.msk.f32.mxu1 %vm320_vm1, %v7633_v61  ;;  %6540 = vmatprep.mubr.msk.f32.mxu0 %vm320_vm1, %v5674_v29  ;;  %v5393_v61 = vld [vmem:[%s6990_s30 + $0xdb] sm:$0xff] }
 0x124   : > { %6288 = vmatmul.mubr.msk.f32.gmra.mrb[28].mxu1 %vm320_vm1, %v7643_v2  ;;  %6541 = vmatmul.mubr.msk.f32.gmra.mrb[10].mxu0 %vm320_vm1, %v5675_v30  ;;  %v5394_v2 = vld [vmem:[%s6990_s30 + $0xe3] sm:$0xff]  ;;  %v7914_v30 = vld [vmem:[%s8054_s2] ss:$0 sm:$0xff] }
 0x125   : > { %6290 = vmatprep.mubr.msk.f32.mxu1 %vm320_vm1, %v7647_v47  ;;  %6543 = vmatprep.mubr.msk.f32.mxu0 %vm320_vm1, %v5676_v31  ;;  %v5395_v47 = vld [vmem:[%s6990_s30 + $0xeb] sm:$0xff] }
 0x128   : > { %6291 = vmatmul.mubr.msk.f32.gmra.mrb[30].mxu1 %vm320_vm1, %v7657_v48  ;;  %6544 = vmatmul.mubr.msk.f32.gmra.mrb[12].mxu0 %vm320_vm1, %v5677_v32  ;;  %v5396_v48 = vld [vmem:[%s6990_s30 + $0xf3] sm:$0xff] }
 0x129   : > { %6293 = vmatprep.mubr.msk.f32.mxu1 %vm320_vm1, %v7661_v52  ;;  %6546 = vmatprep.mubr.msk.f32.mxu0 %vm320_vm1, %v5678_v33  ;;  %v5397_v52 = vld [vmem:[%s6990_s30 + $0xfb] sm:$0xff] }
 0x12a   : > { %v7920_v33 = vld [vmem:[%s8055_s3] ss:$0 sm:$0xff] }
 0x12c   : > { %6294 = vmatmul.mubr.msk.f32.gmra.mrb[32].mxu1 %vm320_vm1, %v7671_v56  ;;  %6547 = vmatmul.mubr.msk.f32.gmra.mrb[14].mxu0 %vm320_vm1, %v5679_v34  ;;  %v5398_v56 = vld [vmem:[%s6990_s30 + $0x103] sm:$0xff] }
 0x12d   : > { %6296 = vmatprep.mubr.msk.f32.mxu1 %vm320_vm1, %v5328_v35  ;;  %6549 = vmatprep.mubr.msk.f32.mxu0 %vm320_vm1, %v5680_v36 }
 0x130   : > { %6297 = vmatmul.mubr.msk.f32.gmra.mrb[34].mxu1 %vm320_vm1, %v5329_v37  ;;  %6550 = vmatmul.mubr.msk.f32.gmra.mrb[16].mxu0 %vm320_vm1, %v5681_v38 }
 0x131   : > { %6328 = vmatprep.mubr.msk.f32.mxu1 %vm320_vm1, %v5386_v39  ;;  %6552 = vmatprep.mubr.msk.f32.mxu0 %vm320_vm1, %v5682_v40 }
 0x134   : > { %6329 = vmatmul.mubr.msk.f32.vlgmr.msra.gmra.mrb[18].mxu1 %vm320_vm1, %v5387_v41  ;;  %6553 = vmatmul.mubr.msk.f32.gmra.mrb[18].mxu0 %vm320_vm1, %v5683_v42 }
 0x135   : > { %6331 = vmatprep.mubr.msk.f32.mxu1 %vm320_vm1, %v5388_v43  ;;  %6555 = vmatprep.mubr.msk.f32.mxu0 %vm320_vm1, %v5684_v44 }
 0x138   : > { %6332 = vmatmul.mubr.msk.f32.gmra.mrb[20].mxu1 %vm320_vm1, %v5389_v45  ;;  %6556 = vmatmul.mubr.msk.f32.gmra.mrb[20].mxu0 %vm320_vm1, %v5685_v46 }
 0x139   : > { %6334 = vmatprep.mubr.msk.f32.mxu1 %vm320_vm1, %v5390_v49  ;;  %6558 = vmatprep.mubr.msk.f32.mxu0 %vm320_vm1, %v5686_v51 }
 0x13c   : > { %6335 = vmatmul.mubr.msk.f32.gmra.mrb[22].mxu1 %vm320_vm1, %v5391_v53  ;;  %6559 = vmatmul.mubr.msk.f32.gmra.mrb[22].mxu0 %vm320_vm1, %v5687_v55 }
 0x13d   : > { %6337 = vmatprep.mubr.msk.f32.mxu1 %vm320_vm1, %v5392_v57  ;;  %6561 = vmatprep.mubr.msk.f32.mxu0 %vm320_vm1, %v5688_v59 }
 0x140   : > { %6338 = vmatmul.mubr.msk.f32.gmra.mrb[24].mxu1 %vm320_vm1, %v5393_v61  ;;  %6562 = vmatmul.mubr.msk.f32.gmra.mrb[24].mxu0 %vm320_vm1, %v5689_v63 }
 0x141   : > { %6340 = vmatprep.mubr.msk.f32.mxu1 %vm320_vm1, %v5394_v2  ;;  %6564 = vmatprep.mubr.msk.f32.mxu0 %vm320_vm1, %v5690_v4 }
 0x144   : > { %6341 = vmatmul.mubr.msk.f32.gmra.mrb[26].mxu1 %vm320_vm1, %v5395_v47  ;;  %6565 = vmatmul.mubr.msk.f32.gmra.mrb[26].mxu0 %vm320_vm1, %v5691_v6 }
 0x145   : > { %6343 = vmatprep.mubr.msk.f32.mxu1 %vm320_vm1, %v5396_v48  ;;  %6567 = vmatprep.mubr.msk.f32.mxu0 %vm320_vm1, %v5692_v50 }
 0x148   : > { %6344 = vmatmul.mubr.msk.f32.gmra.mrb[28].mxu1 %vm320_vm1, %v5397_v52  ;;  %6568 = vmatmul.mubr.msk.f32.gmra.mrb[28].mxu0 %vm320_vm1, %v5693_v54 }
 0x149   : > { %6346 = vmatprep.mubr.msk.f32.mxu1 %vm320_vm1, %v5398_v56  ;;  %6570 = vmatprep.mubr.msk.f32.mxu0 %vm320_vm1, %v5694_v58 }
 0x14c   : > { %6347 = vmatmul.mubr.msk.f32.gmra.mrb[30].mxu1 %vm320_vm1, %v5399_v60  ;;  %6571 = vmatmul.mubr.msk.f32.gmra.mrb[30].mxu0 %vm320_vm1, %v5695_v62 }
 0x14d   : > { %6349 = vmatprep.mubr.msk.f32.mxu1 %vm320_vm1, %v5400_v0  ;;  %6573 = vmatprep.mubr.msk.f32.mxu0 %vm320_vm1, %v5696_v3 }
 0x150   : > { %6350 = vmatmul.mubr.msk.f32.gmra.mrb[32].mxu1 %vm320_vm1, %v5401_v5  ;;  %6574 = vmatmul.mubr.msk.f32.gmra.mrb[32].mxu0 %vm320_vm1, %v5697_v1 }
 0x151   : > { %6352 = vmatprep.mubr.msk.f32.mxu1 %vm320_vm1, %v5402_v7  ;;  %6576 = vmatprep.mubr.msk.f32.mxu0 %vm320_vm1, %v5698_v8 }
 0x154   : > { %6353 = vmatmul.mubr.msk.f32.gmra.mrb[34].mxu1 %vm320_vm1, %v5403_v9  ;;  %6577 = vmatmul.mubr.msk.f32.gmra.mrb[34].mxu0 %vm320_vm1, %v5699_v10 }
 0x1bf   : > { %v6247_v12 = vpop.f32.mrb[0].mxu1 }
 0x1c0   : > { %v1939_v13 = vpop.f32.mrb[1].mxu1 }
 0x1c3   : > { %v6250_v14 = vpop.f32.mrb[2].mxu1 }
 0x1c4   : > { %v1949_v15 = vpop.f32.mrb[3].mxu1 }
 0x1c7   : > { %v6253_v16 = vpop.f32.mrb[4].mxu1 }
 0x1c8   : > { %v1959_v17 = vpop.f32.mrb[5].mxu1 }
 0x1cb   : > { %v6256_v18 = vpop.f32.mrb[6].mxu1 }
 0x1cc   : > { %v1969_v19 = vpop.f32.mrb[7].mxu1 }
 0x1cf   : > { %v6259_v20 = vpop.f32.mrb[8].mxu1 }
 0x1d0   : > { %v1979_v21 = vpop.f32.mrb[9].mxu1 }
 0x1d3   : > { %v7895_v22 = vpop.f32.mrb[10].mxu1 }
 0x1d4   : > { %v7897_v23 = vpop.f32.mrb[11].mxu1 }
 0x1d7   : > { %v7899_v24 = vpop.f32.mrb[12].mxu1 }
 0x1d8   : > { %v7901_v25 = vpop.f32.mrb[13].mxu1 }
 0x1db   : > { %v7903_v26 = vpop.f32.mrb[14].mxu1 }
 0x1dc   : > { %v7905_v27 = vpop.f32.mrb[15].mxu1 }
 0x1df   : > { %v7907_v11 = vpop.f32.mrb[16].mxu1 }
 0x1e0   : > { %v7909_v28 = vpop.f32.mrb[17].mxu1 }
 0x1e3   : > { %v6527_v29 = vpop.f32.mrb[0].mxu0 }
 0x1e4   : > { %v6581_v31 = vadd.f32 %v6527_v29, %v6247_v12  ;;  %v4459_v32 = vpop.f32.mrb[1].mxu0 }
 0x1e5   : > { %v6582_v34 = vadd.f32 %v4459_v32, %v1939_v13 }
 0x1e6   : > { %v4790_v35 = vmul.f32 %v6581_v31, %v7914_v30 }
 0x1e7   : > { %v4789_v36 = vmul.f32 %v6582_v34, %v7914_v30  ;;  %v6530_v37 = vpop.f32.mrb[2].mxu0 }
 0x1e8   : > { %v4833_v38 = vadd.f32 %v7920_v33, %v4790_v35  ;;  %v6583_v39 = vadd.f32 %v6530_v37, %v6250_v14  ;;  %v4469_v40 = vpop.f32.mrb[3].mxu0 }
 0x1e9   : > { %v4832_v41 = vadd.f32 %v7920_v33, %v4789_v36  ;;  %v6584_v42 = vadd.f32 %v4469_v40, %v1949_v15 }
 0x1ea   : > { %v4869_v43 = vmax.f32 %v4833_v38, 0.0  ;;  %v4792_v44 = vmul.f32 %v6583_v39, %v7914_v30 }
 0x1eb   : > { %v4868_v45 = vmax.f32 %v4832_v41, 0.0  ;;  %v4791_v46 = vmul.f32 %v6584_v42, %v7914_v30  ;;  %v6533_v49 = vpop.f32.mrb[4].mxu0 }
 0x1ec   : > { %4905 = vst [vmem:[%s7928_s26 + $0x8] sm:$0xff] %v4869_v43  ;;  %v4835_v51 = vadd.f32 %v7920_v33, %v4792_v44  ;;  %v6585_v53 = vadd.f32 %v6533_v49, %v6253_v16  ;;  %v4479_v55 = vpop.f32.mrb[5].mxu0 }
 0x1ed   : > { %4904 = vst [vmem:[%s7928_s26] sm:$0xff] %v4868_v45  ;;  %v4834_v57 = vadd.f32 %v7920_v33, %v4791_v46  ;;  %v6586_v59 = vadd.f32 %v4479_v55, %v1959_v17 }
 0x1ee   : > { %v4871_v61 = vmax.f32 %v4835_v51, 0.0  ;;  %v4794_v63 = vmul.f32 %v6585_v53, %v7914_v30 }
 0x1ef   : > { %v4870_v2 = vmax.f32 %v4834_v57, 0.0  ;;  %v4793_v4 = vmul.f32 %v6586_v59, %v7914_v30  ;;  %v6536_v47 = vpop.f32.mrb[6].mxu0 }
 0x1f0   : > { %4907 = vst [vmem:[%s7928_s26 + $0x18] sm:$0xff] %v4871_v61  ;;  %v4837_v6 = vadd.f32 %v7920_v33, %v4794_v63  ;;  %v6587_v48 = vadd.f32 %v6536_v47, %v6256_v18  ;;  %v4489_v50 = vpop.f32.mrb[7].mxu0 }
 0x1f1   : > { %4906 = vst [vmem:[%s7928_s26 + $0x10] sm:$0xff] %v4870_v2  ;;  %v4836_v52 = vadd.f32 %v7920_v33, %v4793_v4  ;;  %v6588_v54 = vadd.f32 %v4489_v50, %v1969_v19 }
 0x1f2   : > { %v4873_v56 = vmax.f32 %v4837_v6, 0.0  ;;  %v4796_v58 = vmul.f32 %v6587_v48, %v7914_v30 }
 0x1f3   : > { %v4872_v60 = vmax.f32 %v4836_v52, 0.0  ;;  %v4795_v62 = vmul.f32 %v6588_v54, %v7914_v30  ;;  %v6539_v0 = vpop.f32.mrb[8].mxu0 }
 0x1f4   : > { %4909 = vst [vmem:[%s7928_s26 + $0x28] sm:$0xff] %v4873_v56  ;;  %v4839_v3 = vadd.f32 %v7920_v33, %v4796_v58  ;;  %v6589_v5 = vadd.f32 %v6539_v0, %v6259_v20  ;;  %v4499_v1 = vpop.f32.mrb[9].mxu0 }
 0x1f5   : > { %4908 = vst [vmem:[%s7928_s26 + $0x20] sm:$0xff] %v4872_v60  ;;  %v4838_v7 = vadd.f32 %v7920_v33, %v4795_v62  ;;  %v6590_v8 = vadd.f32 %v4499_v1, %v1979_v21 }
 0x1f6   : > { %v4875_v9 = vmax.f32 %v4839_v3, 0.0  ;;  %v4798_v10 = vmul.f32 %v6589_v5, %v7914_v30 }
 0x1f7   : > { %v4874_v12 = vmax.f32 %v4838_v7, 0.0  ;;  %v4797_v13 = vmul.f32 %v6590_v8, %v7914_v30  ;;  %v6542_v14 = vpop.f32.mrb[10].mxu0 }
 0x1f8   : > { %4911 = vst [vmem:[%s7928_s26 + $0x38] sm:$0xff] %v4875_v9  ;;  %v4841_v15 = vadd.f32 %v7920_v33, %v4798_v10  ;;  %v6591_v16 = vadd.f32 %v6542_v14, %v7895_v22  ;;  %v4509_v17 = vpop.f32.mrb[11].mxu0 }
 0x1f9   : > { %4910 = vst [vmem:[%s7928_s26 + $0x30] sm:$0xff] %v4874_v12  ;;  %v4840_v18 = vadd.f32 %v7920_v33, %v4797_v13  ;;  %v6592_v19 = vadd.f32 %v4509_v17, %v7897_v23 }
 0x1fa   : > { %v4877_v20 = vmax.f32 %v4841_v15, 0.0  ;;  %v4800_v21 = vmul.f32 %v6591_v16, %v7914_v30 }
 0x1fb   : > { %v4876_v29 = vmax.f32 %v4840_v18, 0.0  ;;  %v4799_v31 = vmul.f32 %v6592_v19, %v7914_v30  ;;  %v6545_v32 = vpop.f32.mrb[12].mxu0 }
 0x1fc   : > { %4913 = vst [vmem:[%s7928_s26 + $0x48] sm:$0xff] %v4877_v20  ;;  %v4843_v34 = vadd.f32 %v7920_v33, %v4800_v21  ;;  %v6593_v22 = vadd.f32 %v6545_v32, %v7899_v24  ;;  %v4519_v35 = vpop.f32.mrb[13].mxu0 }
 0x1fd   : > { %4912 = vst [vmem:[%s7928_s26 + $0x40] sm:$0xff] %v4876_v29  ;;  %v4842_v36 = vadd.f32 %v7920_v33, %v4799_v31  ;;  %v6594_v23 = vadd.f32 %v4519_v35, %v7901_v25 }
 0x1fe   : > { %v4879_v37 = vmax.f32 %v4843_v34, 0.0  ;;  %v4802_v38 = vmul.f32 %v6593_v22, %v7914_v30 }
 0x1ff   : > { %v4878_v39 = vmax.f32 %v4842_v36, 0.0  ;;  %v4801_v40 = vmul.f32 %v6594_v23, %v7914_v30  ;;  %v6548_v41 = vpop.f32.mrb[14].mxu0 }
 0x200   : > { %4915 = vst [vmem:[%s7928_s26 + $0x58] sm:$0xff] %v4879_v37  ;;  %v4845_v42 = vadd.f32 %v7920_v33, %v4802_v38  ;;  %v6595_v24 = vadd.f32 %v6548_v41, %v7903_v26  ;;  %v4529_v43 = vpop.f32.mrb[15].mxu0 }
 0x201   : > { %4914 = vst [vmem:[%s7928_s26 + $0x50] sm:$0xff] %v4878_v39  ;;  %v4844_v44 = vadd.f32 %v7920_v33, %v4801_v40  ;;  %v6596_v25 = vadd.f32 %v4529_v43, %v7905_v27 }
 0x202   : > { %v4881_v45 = vmax.f32 %v4845_v42, 0.0  ;;  %v4804_v46 = vmul.f32 %v6595_v24, %v7914_v30 }
 0x203   : > { %v4880_v49 = vmax.f32 %v4844_v44, 0.0  ;;  %v4803_v51 = vmul.f32 %v6596_v25, %v7914_v30  ;;  %v6551_v53 = vpop.f32.mrb[16].mxu0 }
 0x204   : > { %4917 = vst [vmem:[%s7928_s26 + $0x68] sm:$0xff] %v4881_v45  ;;  %v4847_v55 = vadd.f32 %v7920_v33, %v4804_v46  ;;  %v6597_v57 = vadd.f32 %v6551_v53, %v7907_v11  ;;  %v4539_v26 = vpop.f32.mrb[17].mxu0 }
 0x205   : > { %4916 = vst [vmem:[%s7928_s26 + $0x60] sm:$0xff] %v4880_v49  ;;  %v4846_v59 = vadd.f32 %v7920_v33, %v4803_v51  ;;  %v6598_v27 = vadd.f32 %v4539_v26, %v7909_v28 }
 0x206   : > { %v4883_v61 = vmax.f32 %v4847_v55, 0.0  ;;  %v4806_v63 = vmul.f32 %v6597_v57, %v7914_v30 }
 0x207   : > { %v4882_v2 = vmax.f32 %v4846_v59, 0.0  ;;  %v4805_v4 = vmul.f32 %v6598_v27, %v7914_v30  ;;  %v6330_v47 = vpop.f32.mrb[18].mxu1  ;;  %v6554_v6 = vpop.f32.mrb[18].mxu0 }
 0x208   : > { %4919 = vst [vmem:[%s7928_s26 + $0x78] sm:$0xff] %v4883_v61  ;;  %v4849_v48 = vadd.f32 %v7920_v33, %v4806_v63  ;;  %v6599_v11 = vadd.f32 %v6554_v6, %v6330_v47  ;;  %v2533_v50 = vpop.f32.mrb[19].mxu1  ;;  %v4549_v52 = vpop.f32.mrb[19].mxu0 }
 0x209   : > { %4918 = vst [vmem:[%s7928_s26 + $0x70] sm:$0xff] %v4882_v2  ;;  %v4848_v54 = vadd.f32 %v7920_v33, %v4805_v4  ;;  %v6600_v28 = vadd.f32 %v4549_v52, %v2533_v50 }
 0x20a   : > { %v4885_v56 = vmax.f32 %v4849_v48, 0.0  ;;  %v4808_v58 = vmul.f32 %v6599_v11, %v7914_v30 }
 0x20b   : > { %v4884_v60 = vmax.f32 %v4848_v54, 0.0  ;;  %v4807_v62 = vmul.f32 %v6600_v28, %v7914_v30  ;;  %v6333_v0 = vpop.f32.mrb[20].mxu1  ;;  %v6557_v3 = vpop.f32.mrb[20].mxu0 }
 0x20c   : > { %4921 = vst [vmem:[%s7928_s26 + $0x88] sm:$0xff] %v4885_v56  ;;  %v4851_v5 = vadd.f32 %v7920_v33, %v4808_v58  ;;  %v6601_v1 = vadd.f32 %v6557_v3, %v6333_v0  ;;  %v2543_v7 = vpop.f32.mrb[21].mxu1  ;;  %v4559_v8 = vpop.f32.mrb[21].mxu0 }
 0x20d   : > { %4920 = vst [vmem:[%s7928_s26 + $0x80] sm:$0xff] %v4884_v60  ;;  %v4850_v9 = vadd.f32 %v7920_v33, %v4807_v62  ;;  %v6602_v10 = vadd.f32 %v4559_v8, %v2543_v7 }
 0x20e   : > { %v4887_v12 = vmax.f32 %v4851_v5, 0.0  ;;  %v4810_v13 = vmul.f32 %v6601_v1, %v7914_v30 }
 0x20f   : > { %v4886_v14 = vmax.f32 %v4850_v9, 0.0  ;;  %v4809_v15 = vmul.f32 %v6602_v10, %v7914_v30  ;;  %v6336_v16 = vpop.f32.mrb[22].mxu1  ;;  %v6560_v17 = vpop.f32.mrb[22].mxu0 }
 0x210   : > { %4923 = vst [vmem:[%s7928_s26 + $0x98] sm:$0xff] %v4887_v12  ;;  %v4853_v18 = vadd.f32 %v7920_v33, %v4810_v13  ;;  %v6603_v19 = vadd.f32 %v6560_v17, %v6336_v16  ;;  %v2553_v20 = vpop.f32.mrb[23].mxu1  ;;  %v4569_v21 = vpop.f32.mrb[23].mxu0 }
 0x211   : > { %4922 = vst [vmem:[%s7928_s26 + $0x90] sm:$0xff] %v4886_v14  ;;  %v4852_v29 = vadd.f32 %v7920_v33, %v4809_v15  ;;  %v6604_v31 = vadd.f32 %v4569_v21, %v2553_v20 }
 0x212   : > { %v4889_v32 = vmax.f32 %v4853_v18, 0.0  ;;  %v4812_v34 = vmul.f32 %v6603_v19, %v7914_v30 }
 0x213   : > { %v4888_v22 = vmax.f32 %v4852_v29, 0.0  ;;  %v4811_v35 = vmul.f32 %v6604_v31, %v7914_v30  ;;  %v6339_v36 = vpop.f32.mrb[24].mxu1  ;;  %v6563_v23 = vpop.f32.mrb[24].mxu0 }
 0x214   : > { %4925 = vst [vmem:[%s7928_s26 + $0xa8] sm:$0xff] %v4889_v32  ;;  %v4855_v37 = vadd.f32 %v7920_v33, %v4812_v34  ;;  %v6605_v38 = vadd.f32 %v6563_v23, %v6339_v36  ;;  %v2563_v39 = vpop.f32.mrb[25].mxu1  ;;  %v4579_v40 = vpop.f32.mrb[25].mxu0 }
 0x215   : > { %4924 = vst [vmem:[%s7928_s26 + $0xa0] sm:$0xff] %v4888_v22  ;;  %v4854_v41 = vadd.f32 %v7920_v33, %v4811_v35  ;;  %v6606_v42 = vadd.f32 %v4579_v40, %v2563_v39 }
 0x216   : > { %v4891_v24 = vmax.f32 %v4855_v37, 0.0  ;;  %v4814_v43 = vmul.f32 %v6605_v38, %v7914_v30 }
 0x217   : > { %v4890_v44 = vmax.f32 %v4854_v41, 0.0  ;;  %v4813_v25 = vmul.f32 %v6606_v42, %v7914_v30  ;;  %v6342_v45 = vpop.f32.mrb[26].mxu1  ;;  %v6566_v46 = vpop.f32.mrb[26].mxu0 }
 0x218   : > { %4927 = vst [vmem:[%s7928_s26 + $0xb8] sm:$0xff] %v4891_v24  ;;  %v4857_v49 = vadd.f32 %v7920_v33, %v4814_v43  ;;  %v6607_v51 = vadd.f32 %v6566_v46, %v6342_v45  ;;  %v2573_v53 = vpop.f32.mrb[27].mxu1  ;;  %v4589_v55 = vpop.f32.mrb[27].mxu0 }
 0x219   : > { %4926 = vst [vmem:[%s7928_s26 + $0xb0] sm:$0xff] %v4890_v44  ;;  %v4856_v57 = vadd.f32 %v7920_v33, %v4813_v25  ;;  %v6608_v26 = vadd.f32 %v4589_v55, %v2573_v53 }
 0x21a   : > { %v4893_v59 = vmax.f32 %v4857_v49, 0.0  ;;  %v4816_v27 = vmul.f32 %v6607_v51, %v7914_v30 }
 0x21b   : > { %v4892_v61 = vmax.f32 %v4856_v57, 0.0  ;;  %v4815_v63 = vmul.f32 %v6608_v26, %v7914_v30  ;;  %v6345_v2 = vpop.f32.mrb[28].mxu1  ;;  %v6569_v4 = vpop.f32.mrb[28].mxu0 }
 0x21c   : > { %4929 = vst [vmem:[%s7928_s26 + $0xc8] sm:$0xff] %v4893_v59  ;;  %v4859_v47 = vadd.f32 %v7920_v33, %v4816_v27  ;;  %v6609_v6 = vadd.f32 %v6569_v4, %v6345_v2  ;;  %v2583_v48 = vpop.f32.mrb[29].mxu1  ;;  %v4599_v11 = vpop.f32.mrb[29].mxu0 }
 0x21d   : > { %4928 = vst [vmem:[%s7928_s26 + $0xc0] sm:$0xff] %v4892_v61  ;;  %v4858_v50 = vadd.f32 %v7920_v33, %v4815_v63  ;;  %v6610_v52 = vadd.f32 %v4599_v11, %v2583_v48 }
 0x21e   : > { %v4895_v54 = vmax.f32 %v4859_v47, 0.0  ;;  %v4818_v28 = vmul.f32 %v6609_v6, %v7914_v30 }
 0x21f   : > { %v4894_v56 = vmax.f32 %v4858_v50, 0.0  ;;  %v4817_v58 = vmul.f32 %v6610_v52, %v7914_v30  ;;  %v6348_v60 = vpop.f32.mrb[30].mxu1  ;;  %v6572_v62 = vpop.f32.mrb[30].mxu0 }
 0x220   : > { %4931 = vst [vmem:[%s7928_s26 + $0xd8] sm:$0xff] %v4895_v54  ;;  %v4861_v0 = vadd.f32 %v7920_v33, %v4818_v28  ;;  %v6611_v3 = vadd.f32 %v6572_v62, %v6348_v60  ;;  %v2593_v5 = vpop.f32.mrb[31].mxu1  ;;  %v4609_v1 = vpop.f32.mrb[31].mxu0 }
 0x221   : > { %4930 = vst [vmem:[%s7928_s26 + $0xd0] sm:$0xff] %v4894_v56  ;;  %v4860_v7 = vadd.f32 %v7920_v33, %v4817_v58  ;;  %v6612_v8 = vadd.f32 %v4609_v1, %v2593_v5 }
 0x222   : > { %v4897_v9 = vmax.f32 %v4861_v0, 0.0  ;;  %v4820_v10 = vmul.f32 %v6611_v3, %v7914_v30 }
 0x223   : > { %v4896_v12 = vmax.f32 %v4860_v7, 0.0  ;;  %v4819_v13 = vmul.f32 %v6612_v8, %v7914_v30  ;;  %v6351_v14 = vpop.f32.mrb[32].mxu1  ;;  %v6575_v15 = vpop.f32.mrb[32].mxu0 }
 0x224   : > { %4933 = vst [vmem:[%s7928_s26 + $0xe8] sm:$0xff] %v4897_v9  ;;  %v4863_v16 = vadd.f32 %v7920_v33, %v4820_v10  ;;  %v6613_v17 = vadd.f32 %v6575_v15, %v6351_v14  ;;  %v2603_v18 = vpop.f32.mrb[33].mxu1  ;;  %v4619_v19 = vpop.f32.mrb[33].mxu0 }
 0x225   : > { %4932 = vst [vmem:[%s7928_s26 + $0xe0] sm:$0xff] %v4896_v12  ;;  %v4862_v20 = vadd.f32 %v7920_v33, %v4819_v13  ;;  %v6614_v21 = vadd.f32 %v4619_v19, %v2603_v18 }
 0x226   : > { %v4899_v29 = vmax.f32 %v4863_v16, 0.0  ;;  %v4822_v31 = vmul.f32 %v6613_v17, %v7914_v30 }
 0x227   : > { %v4898_v32 = vmax.f32 %v4862_v20, 0.0  ;;  %v4821_v34 = vmul.f32 %v6614_v21, %v7914_v30  ;;  %v6354_v22 = vpop.f32.mrb[34].mxu1  ;;  %v6578_v35 = vpop.f32.mrb[34].mxu0 }
 0x228   : > { %4935 = vst [vmem:[%s7928_s26 + $0xf8] sm:$0xff] %v4899_v29  ;;  %v4865_v36 = vadd.f32 %v7920_v33, %v4822_v31  ;;  %v6615_v23 = vadd.f32 %v6578_v35, %v6354_v22  ;;  %v2613_v37 = vpop.f32.mrb[35].mxu1  ;;  %v4629_v38 = vpop.f32.mrb[35].mxu0 }
 0x229   : > { %4934 = vst [vmem:[%s7928_s26 + $0xf0] sm:$0xff] %v4898_v32  ;;  %v4864_v39 = vadd.f32 %v7920_v33, %v4821_v34  ;;  %v6616_v40 = vadd.f32 %v4629_v38, %v2613_v37 }
 0x22a   : > { %v4901_v41 = vmax.f32 %v4865_v36, 0.0  ;;  %v4824_v42 = vmul.f32 %v6615_v23, %v7914_v30 }
 0x22b   : > { %v4900_v24 = vmax.f32 %v4864_v39, 0.0  ;;  %v4823_v43 = vmul.f32 %v6616_v40, %v7914_v30 }
 0x22c   : > { %4937 = vst [vmem:[%s7928_s26 + $0x108] sm:$0xff] %v4901_v41  ;;  %v4867_v44 = vadd.f32 %v7920_v33, %v4824_v42 }
 0x22d   : > { %4936 = vst [vmem:[%s7928_s26 + $0x100] sm:$0xff] %v4900_v24  ;;  %v4866_v25 = vadd.f32 %v7920_v33, %v4823_v43 }
 0x22e   : > { %v4903_v45 = vmax.f32 %v4867_v44, 0.0 }
 0x22f   : > { %v4902_v46 = vmax.f32 %v4866_v25, 0.0 }
 0x230   : > { %4939 = vst [vmem:[%s7928_s26 + $0x118] sm:$0xff] %v4903_v45 }
 0x231   : > { %4938 = vst [vmem:[%s7928_s26 + $0x110] sm:$0xff] %v4902_v46 }
 0x232 PF: > { %s14_s17 = sadd.s32 1, %s6917_s17   ;;  %s8057_s15 = smov %s6913_s16 }
 0x233   : > { %p11_p5 = scmp.ge.s32.totalorder %s14_s17, 4   ;;  %s8058_s16 = smov %s8060_s18 }
 0x235   :  { %13 = sbr.rel (!%p11_p5) target bundleno = 2 (0x2), region = 92 }

</bundles_post_ra>
